<compile_context>
chip_gen: v7x
topology: tpu7x:2x2x1
jax: 0.10.0
libtpu: 0.0.40
codegen_flags: <defaults>
</compile_context>

<pallas_src>
import functools
import math

import jax
import jax.numpy as jnp
from jax.experimental import pallas as pl
from jax.experimental.pallas import tpu as pltpu


# ------------------------------ helpers ------------------------------------

@functools.lru_cache(maxsize=None)
def _vmem_limit_bytes():
    """Generation-aware VMEM limit: 64 MiB cap, but <= 3/4 of physical VMEM."""
    cap = 128 * 1024 * 1024
    try:
        info = pltpu.get_tpu_info()
        cap = int(getattr(info, "vmem_capacity_bytes", cap))
    except Exception:
        pass
    return min(64 * 1024 * 1024, (3 * cap) // 4)


def _cparams(dims):
    return pltpu.CompilerParams(
        dimension_semantics=dims,
        vmem_limit_bytes=_vmem_limit_bytes(),
    )


def _row_tile(n, target=512):
    """Largest divisor of n <= target, preferring multiples of 256, then 128,
    then 8 (MXU-friendly M tiles). Falls back to n."""
    if n % 8 != 0:
        return n
    t = min(target, n)
    for quantum in (256, 128, 8):
        best = 0
        d = quantum
        while d <= t:
            if n % d == 0:
                best = d
            d += quantum
        if best:
            return best
    return n


def _heads_per_group(n_heads, head_dim):
    """Smallest group of heads whose combined width is a 128-lane multiple
    (lane-dense attention loads/stores).  Falls back to all heads (full-width
    block) if no such group exists (e.g. tiny demo shapes)."""
    if head_dim % 128 == 0:
        return 1
    for g in range(1, n_heads + 1):
        if n_heads % g == 0 and (g * head_dim) % 128 == 0:
            return g
    return n_heads


# ----------------------------- Pallas kernels ------------------------------

def _linear_kernel(x_ref, w_ref, b_ref, o_ref, *, activation):
    # bf16 operands on the MXU, f32 accumulation / epilogue, bf16 store.
    y = jnp.dot(x_ref[...].astype(jnp.bfloat16), w_ref[...],
                preferred_element_type=jnp.float32)
    y = y + b_ref[...]
    if activation == "gelu":
        # tanh-approx GELU (PyTorch nn.GELU default is erf; tanh approx is a
        # small, accepted numeric deviation and is EUP friendly).
        y = 0.5 * y * (1.0 + jnp.tanh(0.7978845608028654 * (y + 0.044715 * y * y * y)))
    o_ref[...] = y.astype(o_ref.dtype)


def linear(x, w, b, activation=None, row_tile=512):
    N, K = x.shape
    Hout = w.shape[1]
    tile = _row_tile(N, row_tile)
    return pl.pallas_call(
        functools.partial(_linear_kernel, activation=activation),
        grid=(N // tile,),
        in_specs=[
            pl.BlockSpec((tile, K), lambda i: (i, 0)),
            pl.BlockSpec((K, Hout), lambda i: (0, 0)),
            pl.BlockSpec((1, Hout), lambda i: (0, 0)),
        ],
        out_specs=pl.BlockSpec((tile, Hout), lambda i: (i, 0)),
        out_shape=jax.ShapeDtypeStruct((N, Hout), jnp.bfloat16),
        compiler_params=_cparams(("parallel",)),
    )(x, w, b)


def _linear_add_ln_kernel(x_ref, w_ref, b_ref, r_ref, g_ref, be_ref, o_ref, *, eps):
    # matmul + bias + residual + LayerNorm fused epilogue (f32 math, bf16 store).
    y = jnp.dot(x_ref[...].astype(jnp.bfloat16), w_ref[...],
                preferred_element_type=jnp.float32)
    h = y + b_ref[...] + r_ref[...].astype(jnp.float32)
    mu = jnp.mean(h, axis=-1, keepdims=True)
    var = jnp.mean((h - mu) ** 2, axis=-1, keepdims=True)
    out = (h - mu) * jax.lax.rsqrt(var + eps) * g_ref[...] + be_ref[...]
    o_ref[...] = out.astype(o_ref.dtype)


def linear_add_ln(x, w, b, residual, gamma, beta, eps=1e-12, row_tile=512):
    N, K = x.shape
    Hout = w.shape[1]
    tile = _row_tile(N, row_tile)
    return pl.pallas_call(
        functools.partial(_linear_add_ln_kernel, eps=eps),
        grid=(N // tile,),
        in_specs=[
            pl.BlockSpec((tile, K), lambda i: (i, 0)),
            pl.BlockSpec((K, Hout), lambda i: (0, 0)),
            pl.BlockSpec((1, Hout), lambda i: (0, 0)),
            pl.BlockSpec((tile, Hout), lambda i: (i, 0)),
            pl.BlockSpec((1, Hout), lambda i: (0, 0)),
            pl.BlockSpec((1, Hout), lambda i: (0, 0)),
        ],
        out_specs=pl.BlockSpec((tile, Hout), lambda i: (i, 0)),
        out_shape=jax.ShapeDtypeStruct((N, Hout), jnp.bfloat16),
        compiler_params=_cparams(("parallel",)),
    )(x, w, b, residual, gamma, beta)


def _ln_kernel(x_ref, g_ref, b_ref, o_ref, *, eps):
    h = x_ref[...].astype(jnp.float32)
    mu = jnp.mean(h, axis=-1, keepdims=True)
    var = jnp.mean((h - mu) ** 2, axis=-1, keepdims=True)
    out = (h - mu) * jax.lax.rsqrt(var + eps) * g_ref[...] + b_ref[...]
    o_ref[...] = out.astype(o_ref.dtype)


def layernorm(x, gamma, beta, eps=1e-12, row_tile=512):
    N, H = x.shape
    tile = _row_tile(N, row_tile)
    return pl.pallas_call(
        functools.partial(_ln_kernel, eps=eps),
        grid=(N // tile,),
        in_specs=[
            pl.BlockSpec((tile, H), lambda i: (i, 0)),
            pl.BlockSpec((1, H), lambda i: (0, 0)),
            pl.BlockSpec((1, H), lambda i: (0, 0)),
        ],
        out_specs=pl.BlockSpec((tile, H), lambda i: (i, 0)),
        out_shape=jax.ShapeDtypeStruct((N, H), jnp.bfloat16),
        compiler_params=_cparams(("parallel",)),
    )(x, gamma, beta)


def _attn_kernel(qkv_ref, bias_ref, o_ref, *, heads_per_group):
    # qkv_ref: (1, S, 3*GDh) = [Q_g | K_g | V_g] for one head-group (bf16).
    # bias_ref: (1, 1, S) additive key mask (f32).
    # o_ref:   (1, S, GDh) lane-dense context slab for this group (bf16).
    S = qkv_ref.shape[1]
    gdh = qkv_ref.shape[2] // 3
    G = heads_per_group
    Dh = gdh // G
    qkv = qkv_ref[0]                                   # (S, 3*GDh)
    bias = bias_ref[0]                                 # (1, S)
    q = qkv[:, 0 * gdh:1 * gdh].reshape(S, G, Dh)
    k = qkv[:, 1 * gdh:2 * gdh].reshape(S, G, Dh)
    v = qkv[:, 2 * gdh:3 * gdh].reshape(S, G, Dh)
    # 1/sqrt(Dh) is folded into the Q columns of Wqkv at init time.
    s = jnp.einsum("qgd,kgd->gqk", q, k,
                   preferred_element_type=jnp.float32)  # (G, S, S) f32
    s = s + bias[None, :, :]                            # additive key mask
    s = s - jnp.max(s, axis=-1, keepdims=True)
    p = jnp.exp(s)
    p = p * pl.reciprocal(jnp.sum(p, axis=-1, keepdims=True), approx=True)
    ctx = jnp.einsum("gqk,kgd->qgd", p.astype(jnp.bfloat16), v,
                     preferred_element_type=jnp.float32)  # (S, G, Dh)
    o_ref[0] = ctx.reshape(S, gdh).astype(o_ref.dtype)


def attention(qkv, attn_bias, n_heads, heads_per_group):
    # qkv: (B, S, 3H) group-major packed [Qg|Kg|Vg]*n_groups; bias: (B, 1, S).
    B, S, H3 = qkv.shape
    H = H3 // 3
    Dh = H // n_heads
    G = heads_per_group
    gdh = G * Dh
    n_groups = n_heads // G
    return pl.pallas_call(
        functools.partial(_attn_kernel, heads_per_group=G),
        grid=(B, n_groups),
        in_specs=[
            pl.BlockSpec((1, S, 3 * gdh), lambda b, g: (b, 0, g)),
            pl.BlockSpec((1, 1, S), lambda b, g: (b, 0, 0)),
        ],
        out_specs=pl.BlockSpec((1, S, gdh), lambda b, g: (b, 0, g)),
        out_shape=jax.ShapeDtypeStruct((B, S, H), jnp.bfloat16),
        compiler_params=_cparams(("parallel", "parallel")),
    )(qkv, attn_bias)


def _pool_kernel(x_ref, o_ref):
    # mean over the sequence axis == avg_pool1d(kernel_size=seq_len); f32 math.
    o_ref[...] = jnp.mean(x_ref[...].astype(jnp.float32), axis=1, keepdims=True)


def mean_pool(x):
    B, S, H = x.shape
    out = pl.pallas_call(
        _pool_kernel,
        grid=(B,),
        in_specs=[pl.BlockSpec((1, S, H), lambda b: (b, 0, 0))],
        out_specs=pl.BlockSpec((1, 1, H), lambda b: (b, 0, 0)),
        out_shape=jax.ShapeDtypeStruct((B, 1, H), jnp.float32),
        compiler_params=_cparams(("parallel",)),
    )(x)
    return out.reshape(B, H)


# ------------------------------ BERT encoder -------------------------------

def _pack_grouped_qkv(wq, wk, wv, n_heads, heads_per_group, scale, wdt):
    """Pack [Qg | Kg | Vg] per head-group along columns; fold 1/sqrt(Dh) into Q."""
    H = wq.shape[1]
    Dh = H // n_heads
    cols = []
    for g0 in range(0, n_heads, heads_per_group):
        sl = slice(g0 * Dh, (g0 + heads_per_group) * Dh)
        cols += [wq[:, sl] * scale, wk[:, sl], wv[:, sl]]
    return jnp.concatenate(cols, axis=1).astype(wdt)


def init_bert_params(key, vocab, max_pos, hidden, intermediate, n_layers, n_heads):
    wdt = jnp.bfloat16   # weights fed to the MXU stored in bf16
    Dh = hidden // n_heads
    G = _heads_per_group(n_heads, Dh)
    scale = 1.0 / math.sqrt(Dh)

    def normal(k, shape, dtype=jnp.float32):
        return (0.02 * jax.random.normal(k, shape, dtype=jnp.float32)).astype(dtype)

    keys = jax.random.split(key, 3 + 4 * n_layers)
    params = {
        "word_emb": normal(keys[0], (vocab, hidden)),
        "pos_emb": normal(keys[1], (max_pos, hidden)),
        "type_emb": normal(keys[2], (2, hidden)),
        "emb_ln_g": jnp.ones((1, hidden), jnp.float32),
        "emb_ln_b": jnp.zeros((1, hidden), jnp.float32),
        "layers": [],
    }
    for l in range(n_layers):
        k = keys[3 + 4 * l: 3 + 4 * (l + 1)]
        kq, kk, kv = jax.random.split(k[0], 3)
        wq = normal(kq, (hidden, hidden))
        wk = normal(kk, (hidden, hidden))
        wv = normal(kv, (hidden, hidden))
        # NOTE: when loading real checkpoints, the QKV bias must be packed
        # group-major and its Q part scaled identically (zeros here).
        params["layers"].append({
            "Wqkv": _pack_grouped_qkv(wq, wk, wv, n_heads, G, scale, wdt),  # (H, 3H)
            "bqkv": jnp.zeros((1, 3 * hidden), jnp.float32),
            "Wo": normal(k[1], (hidden, hidden), wdt),
            "bo": jnp.zeros((1, hidden), jnp.float32),
            "ln1_g": jnp.ones((1, hidden), jnp.float32),
            "ln1_b": jnp.zeros((1, hidden), jnp.float32),
            "Wi": normal(k[2], (hidden, intermediate), wdt),
            "bi": jnp.zeros((1, intermediate), jnp.float32),
            "Wf": normal(k[3], (intermediate, hidden), wdt),
            "bf": jnp.zeros((1, hidden), jnp.float32),
            "ln2_g": jnp.ones((1, hidden), jnp.float32),
            "ln2_b": jnp.zeros((1, hidden), jnp.float32),
        })
    return params


def bert_encode(params, input_ids, attn_mask, n_heads):
    B, S = input_ids.shape
    H = params["word_emb"].shape[1]
    G = _heads_per_group(n_heads, H // n_heads)

    # embeddings (gather is glue; token_type_ids assumed all-zero as each
    # sentence is encoded independently)
    x = (jnp.take(params["word_emb"], input_ids, axis=0)
         + params["pos_emb"][:S][None, :, :]
         + params["type_emb"][0][None, None, :]).astype(jnp.float32)
    x2 = layernorm(x.reshape(B * S, H), params["emb_ln_g"], params["emb_ln_b"])

    # additive key-mask bias precomputed once (0 for valid, -1e9 for padding)
    attn_bias = jnp.where(attn_mask, 0.0, -1e9).astype(jnp.float32).reshape(B, 1, S)

    for lp in params["layers"]:
        qkv = linear(x2, lp["Wqkv"], lp["bqkv"])                       # (B*S, 3H) fused QKV
        ctx = attention(qkv.reshape(B, S, 3 * H), attn_bias, n_heads, G)  # (B, S, H)
        x2 = linear_add_ln(ctx.reshape(B * S, H), lp["Wo"], lp["bo"],
                           x2, lp["ln1_g"], lp["ln1_b"])               # o-proj + add&LN fused
        hmid = linear(x2, lp["Wi"], lp["bi"], activation="gelu")
        x2 = linear_add_ln(hmid, lp["Wf"], lp["bf"],
                           x2, lp["ln2_g"], lp["ln2_b"])               # FFN-out + add&LN fused

    return x2.reshape(B, S, H)


def model_forward(params, s1_input_ids, s2_input_ids, n_heads):
    B = s1_input_ids.shape[0]
    # encode both sentences in a single pass over batch 2B
    ids = jnp.concatenate([s1_input_ids, s2_input_ids], axis=0)
    mask = (ids != 0)                                # torch.ne(ids, 0)
    h = bert_encode(params, ids, mask, n_heads)      # (2B, S, H) bf16
    pooled = mean_pool(h)                            # (2B, H) f32 == avg_pool1d over seq
    return pooled[:B], pooled[B:]


# ---------------------------------- main ------------------------------------

if __name__ == "__main__":
    B, S = 2, 8
    VOCAB, HIDDEN, INTER, N_HEADS, N_LAYERS, MAX_POS = 128, 32, 64, 2, 2, 64

    key = jax.random.PRNGKey(0)
    k_params, k_s1, k_s2 = jax.random.split(key, 3)
    params = init_bert_params(k_params, VOCAB, MAX_POS, HIDDEN, INTER, N_LAYERS, N_HEADS)

    s1_ids = jax.random.randint(k_s1, (B, S), 1, VOCAB, dtype=jnp.int32)
    s2_ids = jax.random.randint(k_s2, (B, S), 1, VOCAB, dtype=jnp.int32)
    # introduce padding (id 0) so the != 0 attention mask is exercised
    s1_ids = s1_ids.at[:, -2:].set(0)
    s2_ids = s2_ids.at[1, -3:].set(0)

    fwd = jax.jit(functools.partial(model_forward, n_heads=N_HEADS))
    s1_vec, s2_vec = fwd(params, s1_ids, s2_ids)
    jax.block_until_ready((s1_vec, s2_vec))

    assert s1_vec.shape == (B, HIDDEN) and s2_vec.shape == (B, HIDDEN)
    assert bool(jnp.all(jnp.isfinite(s1_vec))) and bool(jnp.all(jnp.isfinite(s2_vec)))
    print("KERNEL_OK")
</pallas_src>

<mosaic_0001>
module attributes {stable_mosaic.version = 11 : i64} {
  func.func @_linear_kernel(%arg0: i32, %arg1: memref<32x32xbf16, #tpu.memory_space<vmem>>, %arg2: memref<32x96xbf16, #tpu.memory_space<vmem>>, %arg3: memref<1x96xf32, #tpu.memory_space<vmem>>, %arg4: memref<32x96xbf16, #tpu.memory_space<vmem>>) attributes {dimension_semantics = [#tpu.dimension_semantics<parallel>], iteration_bounds = array<i64: 1>, scalar_prefetch = 0 : i64, scratch_operands = 0 : i64, tpu.core_type = #tpu.core_type<tc>, window_params = [{transform_indices = @transform_0, window_bounds = array<i64: 32, 32>}, {pipeline_mode = #tpu.pipeline_mode<synchronous>, transform_indices = @transform_1, window_bounds = array<i64: 32, 96>}, {pipeline_mode = #tpu.pipeline_mode<synchronous>, transform_indices = @transform_2, window_bounds = array<i64: 1, 96>}, {transform_indices = @transform_3, window_bounds = array<i64: 32, 96>}]} {
    %c0 = arith.constant 0 : index
    %c0_0 = arith.constant 0 : index
    %0 = vector.load %arg1[%c0, %c0_0] : memref<32x32xbf16, #tpu.memory_space<vmem>>, vector<32x32xbf16>
    %c0_1 = arith.constant 0 : index
    %c0_2 = arith.constant 0 : index
    %1 = vector.load %arg2[%c0_1, %c0_2] : memref<32x96xbf16, #tpu.memory_space<vmem>>, vector<32x96xbf16>
    %cst = arith.constant dense<0.000000e+00> : vector<32x96xf32>
    %2 = tpu.matmul %0, %1, %cst {dimension_numbers = #tpu.dot_dimension_numbers<[1], [0], [0], [1], [0, 0, 1, 1], [], []>} : vector<32x32xbf16>, vector<32x96xbf16>, vector<32x96xf32> -> vector<32x96xf32>
    %c0_3 = arith.constant 0 : index
    %c0_4 = arith.constant 0 : index
    %3 = vector.load %arg3[%c0_3, %c0_4] : memref<1x96xf32, #tpu.memory_space<vmem>>, vector<1x96xf32>
    %4 = vector.broadcast %3 : vector<1x96xf32> to vector<32x96xf32>
    %5 = arith.addf %2, %4 : vector<32x96xf32>
    %6 = arith.truncf %5 : vector<32x96xf32> to vector<32x96xbf16>
    %c0_5 = arith.constant 0 : index
    %c0_6 = arith.constant 0 : index
    %7 = vector.load %arg4[%c0_5, %c0_6] : memref<32x96xbf16, #tpu.memory_space<vmem>>, vector<32x96xbf16>
    tpu.vector_store %arg4[%c0_5, %c0_6], %6 {strides = array<i32>} : memref<32x96xbf16, #tpu.memory_space<vmem>>, vector<32x96xbf16>,
    return
  }
  func.func @transform_0(%arg0: i32) -> (i32, i32) {
    %c0_i32 = arith.constant 0 : i32
    %c0_i32_0 = arith.constant 0 : i32
    return %arg0, %c0_i32 : i32, i32
  }
  func.func @transform_1(%arg0: i32) -> (i32, i32) {
    %c0_i32 = arith.constant 0 : i32
    %c0_i32_0 = arith.constant 0 : i32
    %c0_i32_1 = arith.constant 0 : i32
    return %c0_i32, %c0_i32_0 : i32, i32
  }
  func.func @transform_2(%arg0: i32) -> (i32, i32) {
    %c0_i32 = arith.constant 0 : i32
    %c0_i32_0 = arith.constant 0 : i32
    %c0_i32_1 = arith.constant 0 : i32
    return %c0_i32, %c0_i32_0 : i32, i32
  }
  func.func @transform_3(%arg0: i32) -> (i32, i32) {
    %c0_i32 = arith.constant 0 : i32
    %c0_i32_0 = arith.constant 0 : i32
    return %arg0, %c0_i32 : i32, i32
  }
}

module attributes {stable_mosaic.version = 11 : i64} {
  func.func @_linear_add_ln_kernel(%arg0: i32, %arg1: memref<32x32xbf16, #tpu.memory_space<vmem>>, %arg2: memref<32x32xbf16, #tpu.memory_space<vmem>>, %arg3: memref<1x32xf32, #tpu.memory_space<vmem>>, %arg4: memref<32x32xbf16, #tpu.memory_space<vmem>>, %arg5: memref<1x32xf32, #tpu.memory_space<vmem>>, %arg6: memref<1x32xf32, #tpu.memory_space<vmem>>, %arg7: memref<32x32xbf16, #tpu.memory_space<vmem>>) attributes {dimension_semantics = [#tpu.dimension_semantics<parallel>], iteration_bounds = array<i64: 1>, scalar_prefetch = 0 : i64, scratch_operands = 0 : i64, tpu.core_type = #tpu.core_type<tc>, window_params = [{transform_indices = @transform_0, window_bounds = array<i64: 32, 32>}, {pipeline_mode = #tpu.pipeline_mode<synchronous>, transform_indices = @transform_1, window_bounds = array<i64: 32, 32>}, {pipeline_mode = #tpu.pipeline_mode<synchronous>, transform_indices = @transform_2, window_bounds = array<i64: 1, 32>}, {transform_indices = @transform_3, window_bounds = array<i64: 32, 32>}, {pipeline_mode = #tpu.pipeline_mode<synchronous>, transform_indices = @transform_4, window_bounds = array<i64: 1, 32>}, {pipeline_mode = #tpu.pipeline_mode<synchronous>, transform_indices = @transform_5, window_bounds = array<i64: 1, 32>}, {transform_indices = @transform_6, window_bounds = array<i64: 32, 32>}]} {
    %c0 = arith.constant 0 : index
    %c0_0 = arith.constant 0 : index
    %0 = vector.load %arg1[%c0, %c0_0] : memref<32x32xbf16, #tpu.memory_space<vmem>>, vector<32x32xbf16>
    %c0_1 = arith.constant 0 : index
    %c0_2 = arith.constant 0 : index
    %1 = vector.load %arg2[%c0_1, %c0_2] : memref<32x32xbf16, #tpu.memory_space<vmem>>, vector<32x32xbf16>
    %cst = arith.constant dense<0.000000e+00> : vector<32x32xf32>
    %2 = tpu.matmul %0, %1, %cst {dimension_numbers = #tpu.dot_dimension_numbers<[1], [0], [0], [1], [0, 0, 1, 1], [], []>} : vector<32x32xbf16>, vector<32x32xbf16>, vector<32x32xf32> -> vector<32x32xf32>
    %c0_3 = arith.constant 0 : index
    %c0_4 = arith.constant 0 : index
    %3 = vector.load %arg3[%c0_3, %c0_4] : memref<1x32xf32, #tpu.memory_space<vmem>>, vector<1x32xf32>
    %4 = vector.broadcast %3 : vector<1x32xf32> to vector<32x32xf32>
    %5 = arith.addf %2, %4 : vector<32x32xf32>
    %c0_5 = arith.constant 0 : index
    %c0_6 = arith.constant 0 : index
    %6 = vector.load %arg4[%c0_5, %c0_6] : memref<32x32xbf16, #tpu.memory_space<vmem>>, vector<32x32xbf16>
    %7 = arith.extf %6 : vector<32x32xbf16> to vector<32x32xf32>
    %8 = arith.addf %5, %7 : vector<32x32xf32>
    %cst_7 = arith.constant dense<0.000000e+00> : vector<32xf32>
    %9 = vector.multi_reduction <add>, %8, %cst_7 [1] : vector<32x32xf32> to vector<32xf32>
    %10 = vector.shape_cast %9 : vector<32xf32> to vector<32x1xf32>
    %cst_8 = arith.constant 3.200000e+01 : f32
    %11 = vector.broadcast %cst_8 : f32 to vector<32x1xf32>
    %12 = arith.divf %10, %11 : vector<32x1xf32>
    %13 = vector.broadcast %12 : vector<32x1xf32> to vector<32x32xf32>
    %14 = arith.subf %8, %13 : vector<32x32xf32>
    %15 = arith.mulf %14, %14 : vector<32x32xf32>
    %cst_9 = arith.constant dense<0.000000e+00> : vector<32xf32>
    %16 = vector.multi_reduction <add>, %15, %cst_9 [1] : vector<32x32xf32> to vector<32xf32>
    %17 = vector.shape_cast %16 : vector<32xf32> to vector<32x1xf32>
    %cst_10 = arith.constant 3.200000e+01 : f32
    %18 = vector.broadcast %cst_10 : f32 to vector<32x1xf32>
    %19 = arith.divf %17, %18 : vector<32x1xf32>
    %20 = vector.broadcast %12 : vector<32x1xf32> to vector<32x32xf32>
    %21 = arith.subf %8, %20 : vector<32x32xf32>
    %cst_11 = arith.constant 9.99999996E-13 : f32
    %22 = vector.broadcast %cst_11 : f32 to vector<32x1xf32>
    %23 = arith.addf %19, %22 : vector<32x1xf32>
    %24 = math.rsqrt %23 : vector<32x1xf32>
    %25 = vector.broadcast %24 : vector<32x1xf32> to vector<32x32xf32>
    %26 = arith.mulf %21, %25 : vector<32x32xf32>
    %c0_12 = arith.constant 0 : index
    %c0_13 = arith.constant 0 : index
    %27 = vector.load %arg5[%c0_12, %c0_13] : memref<1x32xf32, #tpu.memory_space<vmem>>, vector<1x32xf32>
    %28 = vector.broadcast %27 : vector<1x32xf32> to vector<32x32xf32>
    %29 = arith.mulf %26, %28 : vector<32x32xf32>
    %c0_14 = arith.constant 0 : index
    %c0_15 = arith.constant 0 : index
    %30 = vector.load %arg6[%c0_14, %c0_15] : memref<1x32xf32, #tpu.memory_space<vmem>>, vector<1x32xf32>
    %31 = vector.broadcast %30 : vector<1x32xf32> to vector<32x32xf32>
    %32 = arith.addf %29, %31 : vector<32x32xf32>
    %33 = arith.truncf %32 : vector<32x32xf32> to vector<32x32xbf16>
    %c0_16 = arith.constant 0 : index
    %c0_17 = arith.constant 0 : index
    %34 = vector.load %arg7[%c0_16, %c0_17] : memref<32x32xbf16, #tpu.memory_space<vmem>>, vector<32x32xbf16>
    tpu.vector_store %arg7[%c0_16, %c0_17], %33 {strides = array<i32>} : memref<32x32xbf16, #tpu.memory_space<vmem>>, vector<32x32xbf16>,
    return
  }
  func.func @transform_0(%arg0: i32) -> (i32, i32) {
    %c0_i32 = arith.constant 0 : i32
    %c0_i32_0 = arith.constant 0 : i32
    return %arg0, %c0_i32 : i32, i32
  }
  func.func @transform_1(%arg0: i32) -> (i32, i32) {
    %c0_i32 = arith.constant 0 : i32
    %c0_i32_0 = arith.constant 0 : i32
    %c0_i32_1 = arith.constant 0 : i32
    return %c0_i32, %c0_i32_0 : i32, i32
  }
  func.func @transform_2(%arg0: i32) -> (i32, i32) {
    %c0_i32 = arith.constant 0 : i32
    %c0_i32_0 = arith.constant 0 : i32
    %c0_i32_1 = arith.constant 0 : i32
    return %c0_i32, %c0_i32_0 : i32, i32
  }
  func.func @transform_3(%arg0: i32) -> (i32, i32) {
    %c0_i32 = arith.constant 0 : i32
    %c0_i32_0 = arith.constant 0 : i32
    return %arg0, %c0_i32 : i32, i32
  }
  func.func @transform_4(%arg0: i32) -> (i32, i32) {
    %c0_i32 = arith.constant 0 : i32
    %c0_i32_0 = arith.constant 0 : i32
    %c0_i32_1 = arith.constant 0 : i32
    return %c0_i32, %c0_i32_0 : i32, i32
  }
  func.func @transform_5(%arg0: i32) -> (i32, i32) {
    %c0_i32 = arith.constant 0 : i32
    %c0_i32_0 = arith.constant 0 : i32
    %c0_i32_1 = arith.constant 0 : i32
    return %c0_i32, %c0_i32_0 : i32, i32
  }
  func.func @transform_6(%arg0: i32) -> (i32, i32) {
    %c0_i32 = arith.constant 0 : i32
    %c0_i32_0 = arith.constant 0 : i32
    return %arg0, %c0_i32 : i32, i32
  }
}

module attributes {stable_mosaic.version = 11 : i64} {
  func.func @_ln_kernel(%arg0: i32, %arg1: memref<32x32xf32, #tpu.memory_space<vmem>>, %arg2: memref<1x32xf32, #tpu.memory_space<vmem>>, %arg3: memref<1x32xf32, #tpu.memory_space<vmem>>, %arg4: memref<32x32xbf16, #tpu.memory_space<vmem>>) attributes {dimension_semantics = [#tpu.dimension_semantics<parallel>], iteration_bounds = array<i64: 1>, scalar_prefetch = 0 : i64, scratch_operands = 0 : i64, tpu.core_type = #tpu.core_type<tc>, window_params = [{transform_indices = @transform_0, window_bounds = array<i64: 32, 32>}, {pipeline_mode = #tpu.pipeline_mode<synchronous>, transform_indices = @transform_1, window_bounds = array<i64: 1, 32>}, {pipeline_mode = #tpu.pipeline_mode<synchronous>, transform_indices = @transform_2, window_bounds = array<i64: 1, 32>}, {transform_indices = @transform_3, window_bounds = array<i64: 32, 32>}]} {
    %c0 = arith.constant 0 : index
    %c0_0 = arith.constant 0 : index
    %0 = vector.load %arg1[%c0, %c0_0] : memref<32x32xf32, #tpu.memory_space<vmem>>, vector<32x32xf32>
    %cst = arith.constant dense<0.000000e+00> : vector<32xf32>
    %1 = vector.multi_reduction <add>, %0, %cst [1] : vector<32x32xf32> to vector<32xf32>
    %2 = vector.shape_cast %1 : vector<32xf32> to vector<32x1xf32>
    %cst_1 = arith.constant 3.200000e+01 : f32
    %3 = vector.broadcast %cst_1 : f32 to vector<32x1xf32>
    %4 = arith.divf %2, %3 : vector<32x1xf32>
    %5 = vector.broadcast %4 : vector<32x1xf32> to vector<32x32xf32>
    %6 = arith.subf %0, %5 : vector<32x32xf32>
    %7 = arith.mulf %6, %6 : vector<32x32xf32>
    %cst_2 = arith.constant dense<0.000000e+00> : vector<32xf32>
    %8 = vector.multi_reduction <add>, %7, %cst_2 [1] : vector<32x32xf32> to vector<32xf32>
    %9 = vector.shape_cast %8 : vector<32xf32> to vector<32x1xf32>
    %cst_3 = arith.constant 3.200000e+01 : f32
    %10 = vector.broadcast %cst_3 : f32 to vector<32x1xf32>
    %11 = arith.divf %9, %10 : vector<32x1xf32>
    %12 = vector.broadcast %4 : vector<32x1xf32> to vector<32x32xf32>
    %13 = arith.subf %0, %12 : vector<32x32xf32>
    %cst_4 = arith.constant 9.99999996E-13 : f32
    %14 = vector.broadcast %cst_4 : f32 to vector<32x1xf32>
    %15 = arith.addf %11, %14 : vector<32x1xf32>
    %16 = math.rsqrt %15 : vector<32x1xf32>
    %17 = vector.broadcast %16 : vector<32x1xf32> to vector<32x32xf32>
    %18 = arith.mulf %13, %17 : vector<32x32xf32>
    %c0_5 = arith.constant 0 : index
    %c0_6 = arith.constant 0 : index
    %19 = vector.load %arg2[%c0_5, %c0_6] : memref<1x32xf32, #tpu.memory_space<vmem>>, vector<1x32xf32>
    %20 = vector.broadcast %19 : vector<1x32xf32> to vector<32x32xf32>
    %21 = arith.mulf %18, %20 : vector<32x32xf32>
    %c0_7 = arith.constant 0 : index
    %c0_8 = arith.constant 0 : index
    %22 = vector.load %arg3[%c0_7, %c0_8] : memref<1x32xf32, #tpu.memory_space<vmem>>, vector<1x32xf32>
    %23 = vector.broadcast %22 : vector<1x32xf32> to vector<32x32xf32>
    %24 = arith.addf %21, %23 : vector<32x32xf32>
    %25 = arith.truncf %24 : vector<32x32xf32> to vector<32x32xbf16>
    %c0_9 = arith.constant 0 : index
    %c0_10 = arith.constant 0 : index
    %26 = vector.load %arg4[%c0_9, %c0_10] : memref<32x32xbf16, #tpu.memory_space<vmem>>, vector<32x32xbf16>
    tpu.vector_store %arg4[%c0_9, %c0_10], %25 {strides = array<i32>} : memref<32x32xbf16, #tpu.memory_space<vmem>>, vector<32x32xbf16>,
    return
  }
  func.func @transform_0(%arg0: i32) -> (i32, i32) {
    %c0_i32 = arith.constant 0 : i32
    %c0_i32_0 = arith.constant 0 : i32
    return %arg0, %c0_i32 : i32, i32
  }
  func.func @transform_1(%arg0: i32) -> (i32, i32) {
    %c0_i32 = arith.constant 0 : i32
    %c0_i32_0 = arith.constant 0 : i32
    %c0_i32_1 = arith.constant 0 : i32
    return %c0_i32, %c0_i32_0 : i32, i32
  }
  func.func @transform_2(%arg0: i32) -> (i32, i32) {
    %c0_i32 = arith.constant 0 : i32
    %c0_i32_0 = arith.constant 0 : i32
    %c0_i32_1 = arith.constant 0 : i32
    return %c0_i32, %c0_i32_0 : i32, i32
  }
  func.func @transform_3(%arg0: i32) -> (i32, i32) {
    %c0_i32 = arith.constant 0 : i32
    %c0_i32_0 = arith.constant 0 : i32
    return %arg0, %c0_i32 : i32, i32
  }
}

module attributes {stable_mosaic.version = 11 : i64} {
  func.func @_attn_kernel(%arg0: i32, %arg1: i32, %arg2: memref<1x8x96xbf16, #tpu.memory_space<vmem>>, %arg3: memref<1x1x8xf32, #tpu.memory_space<vmem>>, %arg4: memref<1x8x32xbf16, #tpu.memory_space<vmem>>) attributes {dimension_semantics = [#tpu.dimension_semantics<parallel>, #tpu.dimension_semantics<parallel>], iteration_bounds = array<i64: 4, 1>, scalar_prefetch = 0 : i64, scratch_operands = 0 : i64, tpu.core_type = #tpu.core_type<tc>, window_params = [{transform_indices = @transform_0, window_bounds = array<i64: 1, 8, 96>}, {transform_indices = @transform_1, window_bounds = array<i64: 1, 1, 8>}, {transform_indices = @transform_2, window_bounds = array<i64: 1, 8, 32>}]} {
    %c0 = arith.constant 0 : index
    %c0_0 = arith.constant 0 : index
    %c0_1 = arith.constant 0 : index
    %0 = vector.load %arg2[%c0, %c0_0, %c0_1] : memref<1x8x96xbf16, #tpu.memory_space<vmem>>, vector<1x8x96xbf16>
    %1 = vector.shape_cast %0 : vector<1x8x96xbf16> to vector<8x96xbf16>
    %c0_2 = arith.constant 0 : index
    %c0_3 = arith.constant 0 : index
    %c0_4 = arith.constant 0 : index
    %2 = vector.load %arg3[%c0_2, %c0_3, %c0_4] : memref<1x1x8xf32, #tpu.memory_space<vmem>>, vector<1x1x8xf32>
    %3 = vector.shape_cast %2 : vector<1x1x8xf32> to vector<1x8xf32>
    %4 = vector.extract_strided_slice %1 {offsets = [0, 0], sizes = [8, 32], strides = [1, 1]} : vector<8x96xbf16> to vector<8x32xbf16>
    %5 = vector.shape_cast %4 : vector<8x32xbf16> to vector<8x2x16xbf16>
    %6 = vector.extract_strided_slice %1 {offsets = [0, 32], sizes = [8, 32], strides = [1, 1]} : vector<8x96xbf16> to vector<8x32xbf16>
    %7 = vector.shape_cast %6 : vector<8x32xbf16> to vector<8x2x16xbf16>
    %8 = vector.extract_strided_slice %1 {offsets = [0, 64], sizes = [8, 32], strides = [1, 1]} : vector<8x96xbf16> to vector<8x32xbf16>
    %9 = vector.shape_cast %8 : vector<8x32xbf16> to vector<8x2x16xbf16>
    "tpu.trace_start"() <{level = 10 : i32, message = "qgd,kgd->gqk"}> : () -> ()
    %cst = arith.constant dense<0.000000e+00> : vector<2x8x8xf32>
    %10 = tpu.matmul %5, %7, %cst {dimension_numbers = #tpu.dot_dimension_numbers<[2], [2], [0], [0], [0, 1, 0, 0, 1, 0], [1], [1]>} : vector<8x2x16xbf16>, vector<8x2x16xbf16>, vector<2x8x8xf32> -> vector<2x8x8xf32>
    "tpu.trace_stop"() : () -> ()
    %11 = vector.shape_cast %3 : vector<1x8xf32> to vector<1x1x8xf32>
    %12 = vector.broadcast %11 : vector<1x1x8xf32> to vector<2x8x8xf32>
    %13 = arith.addf %10, %12 : vector<2x8x8xf32>
    %cst_5 = arith.constant dense<0xFF800000> : vector<2x8xf32>
    %14 = vector.multi_reduction <maximumf>, %13, %cst_5 [2] : vector<2x8x8xf32> to vector<2x8xf32>
    %15 = vector.shape_cast %14 : vector<2x8xf32> to vector<2x8x1xf32>
    %16 = vector.broadcast %15 : vector<2x8x1xf32> to vector<2x8x8xf32>
    %17 = arith.subf %13, %16 : vector<2x8x8xf32>
    %18 = math.exp %17 : vector<2x8x8xf32>
    %cst_6 = arith.constant dense<0.000000e+00> : vector<2x8xf32>
    %19 = vector.multi_reduction <add>, %18, %cst_6 [2] : vector<2x8x8xf32> to vector<2x8xf32>
    %20 = vector.shape_cast %19 : vector<2x8xf32> to vector<2x8x1xf32>
    %21 = tpu.reciprocal %20 {approx = true} : vector<2x8x1xf32> -> vector<2x8x1xf32>
    %22 = vector.broadcast %21 : vector<2x8x1xf32> to vector<2x8x8xf32>
    %23 = arith.mulf %18, %22 : vector<2x8x8xf32>
    %24 = arith.truncf %23 : vector<2x8x8xf32> to vector<2x8x8xbf16>
    "tpu.trace_start"() <{level = 10 : i32, message = "gqk,kgd->qgd"}> : () -> ()
    %cst_7 = arith.constant dense<0.000000e+00> : vector<2x16x8xf32>
    %25 = tpu.matmul %9, %24, %cst_7 {dimension_numbers = #tpu.dot_dimension_numbers<[0], [2], [2], [1], [0, 1, 0, 2, 1, 1], [1], [0]>} : vector<8x2x16xbf16>, vector<2x8x8xbf16>, vector<2x16x8xf32> -> vector<2x16x8xf32>
    %26 = tpu.transpose %25, [2, 0, 1] : vector<2x16x8xf32> -> vector<8x2x16xf32>
    "tpu.trace_stop"() : () -> ()
    %27 = vector.shape_cast %26 : vector<8x2x16xf32> to vector<8x32xf32>
    %28 = arith.truncf %27 : vector<8x32xf32> to vector<8x32xbf16>
    %c0_8 = arith.constant 0 : index
    %c0_9 = arith.constant 0 : index
    %c0_10 = arith.constant 0 : index
    %29 = vector.load %arg4[%c0_8, %c0_9, %c0_10] : memref<1x8x32xbf16, #tpu.memory_space<vmem>>, vector<1x8x32xbf16>
    %30 = vector.shape_cast %29 : vector<1x8x32xbf16> to vector<8x32xbf16>
    %31 = vector.shape_cast %28 : vector<8x32xbf16> to vector<1x8x32xbf16>
    tpu.vector_store %arg4[%c0_8, %c0_9, %c0_10], %31 {strides = array<i32>} : memref<1x8x32xbf16, #tpu.memory_space<vmem>>, vector<1x8x32xbf16>,
    return
  }
  func.func @transform_0(%arg0: i32, %arg1: i32) -> (i32, i32, i32) {
    %c0_i32 = arith.constant 0 : i32
    %c0_i32_0 = arith.constant 0 : i32
    return %arg0, %c0_i32, %arg1 : i32, i32, i32
  }
  func.func @transform_1(%arg0: i32, %arg1: i32) -> (i32, i32, i32) {
    %c0_i32 = arith.constant 0 : i32
    %c0_i32_0 = arith.constant 0 : i32
    %c0_i32_1 = arith.constant 0 : i32
    return %arg0, %c0_i32, %c0_i32_0 : i32, i32, i32
  }
  func.func @transform_2(%arg0: i32, %arg1: i32) -> (i32, i32, i32) {
    %c0_i32 = arith.constant 0 : i32
    %c0_i32_0 = arith.constant 0 : i32
    return %arg0, %c0_i32, %arg1 : i32, i32, i32
  }
}

module attributes {stable_mosaic.version = 11 : i64} {
  func.func @_linear_kernel(%arg0: i32, %arg1: memref<32x32xbf16, #tpu.memory_space<vmem>>, %arg2: memref<32x64xbf16, #tpu.memory_space<vmem>>, %arg3: memref<1x64xf32, #tpu.memory_space<vmem>>, %arg4: memref<32x64xbf16, #tpu.memory_space<vmem>>) attributes {dimension_semantics = [#tpu.dimension_semantics<parallel>], iteration_bounds = array<i64: 1>, scalar_prefetch = 0 : i64, scratch_operands = 0 : i64, tpu.core_type = #tpu.core_type<tc>, window_params = [{transform_indices = @transform_0, window_bounds = array<i64: 32, 32>}, {pipeline_mode = #tpu.pipeline_mode<synchronous>, transform_indices = @transform_1, window_bounds = array<i64: 32, 64>}, {pipeline_mode = #tpu.pipeline_mode<synchronous>, transform_indices = @transform_2, window_bounds = array<i64: 1, 64>}, {transform_indices = @transform_3, window_bounds = array<i64: 32, 64>}]} {
    %c0 = arith.constant 0 : index
    %c0_0 = arith.constant 0 : index
    %0 = vector.load %arg1[%c0, %c0_0] : memref<32x32xbf16, #tpu.memory_space<vmem>>, vector<32x32xbf16>
    %c0_1 = arith.constant 0 : index
    %c0_2 = arith.constant 0 : index
    %1 = vector.load %arg2[%c0_1, %c0_2] : memref<32x64xbf16, #tpu.memory_space<vmem>>, vector<32x64xbf16>
    %cst = arith.constant dense<0.000000e+00> : vector<32x64xf32>
    %2 = tpu.matmul %0, %1, %cst {dimension_numbers = #tpu.dot_dimension_numbers<[1], [0], [0], [1], [0, 0, 1, 1], [], []>} : vector<32x32xbf16>, vector<32x64xbf16>, vector<32x64xf32> -> vector<32x64xf32>
    %c0_3 = arith.constant 0 : index
    %c0_4 = arith.constant 0 : index
    %3 = vector.load %arg3[%c0_3, %c0_4] : memref<1x64xf32, #tpu.memory_space<vmem>>, vector<1x64xf32>
    %4 = vector.broadcast %3 : vector<1x64xf32> to vector<32x64xf32>
    %5 = arith.addf %2, %4 : vector<32x64xf32>
    %cst_5 = arith.constant 5.000000e-01 : f32
    %6 = vector.broadcast %cst_5 : f32 to vector<32x64xf32>
    %7 = arith.mulf %6, %5 : vector<32x64xf32>
    %cst_6 = arith.constant 4.471500e-02 : f32
    %8 = vector.broadcast %cst_6 : f32 to vector<32x64xf32>
    %9 = arith.mulf %8, %5 : vector<32x64xf32>
    %10 = arith.mulf %9, %5 : vector<32x64xf32>
    %11 = arith.mulf %10, %5 : vector<32x64xf32>
    %12 = arith.addf %5, %11 : vector<32x64xf32>
    %cst_7 = arith.constant 0.797884583 : f32
    %13 = vector.broadcast %cst_7 : f32 to vector<32x64xf32>
    %14 = arith.mulf %13, %12 : vector<32x64xf32>
    %15 = math.tanh %14 : vector<32x64xf32>
    %cst_8 = arith.constant 1.000000e+00 : f32
    %16 = vector.broadcast %cst_8 : f32 to vector<32x64xf32>
    %17 = arith.addf %16, %15 : vector<32x64xf32>
    %18 = arith.mulf %7, %17 : vector<32x64xf32>
    %19 = arith.truncf %18 : vector<32x64xf32> to vector<32x64xbf16>
    %c0_9 = arith.constant 0 : index
    %c0_10 = arith.constant 0 : index
    %20 = vector.load %arg4[%c0_9, %c0_10] : memref<32x64xbf16, #tpu.memory_space<vmem>>, vector<32x64xbf16>
    tpu.vector_store %arg4[%c0_9, %c0_10], %19 {strides = array<i32>} : memref<32x64xbf16, #tpu.memory_space<vmem>>, vector<32x64xbf16>,
    return
  }
  func.func @transform_0(%arg0: i32) -> (i32, i32) {
    %c0_i32 = arith.constant 0 : i32
    %c0_i32_0 = arith.constant 0 : i32
    return %arg0, %c0_i32 : i32, i32
  }
  func.func @transform_1(%arg0: i32) -> (i32, i32) {
    %c0_i32 = arith.constant 0 : i32
    %c0_i32_0 = arith.constant 0 : i32
    %c0_i32_1 = arith.constant 0 : i32
    return %c0_i32, %c0_i32_0 : i32, i32
  }
  func.func @transform_2(%arg0: i32) -> (i32, i32) {
    %c0_i32 = arith.constant 0 : i32
    %c0_i32_0 = arith.constant 0 : i32
    %c0_i32_1 = arith.constant 0 : i32
    return %c0_i32, %c0_i32_0 : i32, i32
  }
  func.func @transform_3(%arg0: i32) -> (i32, i32) {
    %c0_i32 = arith.constant 0 : i32
    %c0_i32_0 = arith.constant 0 : i32
    return %arg0, %c0_i32 : i32, i32
  }
}

module attributes {stable_mosaic.version = 11 : i64} {
  func.func @_linear_add_ln_kernel(%arg0: i32, %arg1: memref<32x64xbf16, #tpu.memory_space<vmem>>, %arg2: memref<64x32xbf16, #tpu.memory_space<vmem>>, %arg3: memref<1x32xf32, #tpu.memory_space<vmem>>, %arg4: memref<32x32xbf16, #tpu.memory_space<vmem>>, %arg5: memref<1x32xf32, #tpu.memory_space<vmem>>, %arg6: memref<1x32xf32, #tpu.memory_space<vmem>>, %arg7: memref<32x32xbf16, #tpu.memory_space<vmem>>) attributes {dimension_semantics = [#tpu.dimension_semantics<parallel>], iteration_bounds = array<i64: 1>, scalar_prefetch = 0 : i64, scratch_operands = 0 : i64, tpu.core_type = #tpu.core_type<tc>, window_params = [{transform_indices = @transform_0, window_bounds = array<i64: 32, 64>}, {pipeline_mode = #tpu.pipeline_mode<synchronous>, transform_indices = @transform_1, window_bounds = array<i64: 64, 32>}, {pipeline_mode = #tpu.pipeline_mode<synchronous>, transform_indices = @transform_2, window_bounds = array<i64: 1, 32>}, {transform_indices = @transform_3, window_bounds = array<i64: 32, 32>}, {pipeline_mode = #tpu.pipeline_mode<synchronous>, transform_indices = @transform_4, window_bounds = array<i64: 1, 32>}, {pipeline_mode = #tpu.pipeline_mode<synchronous>, transform_indices = @transform_5, window_bounds = array<i64: 1, 32>}, {transform_indices = @transform_6, window_bounds = array<i64: 32, 32>}]} {
    %c0 = arith.constant 0 : index
    %c0_0 = arith.constant 0 : index
    %0 = vector.load %arg1[%c0, %c0_0] : memref<32x64xbf16, #tpu.memory_space<vmem>>, vector<32x64xbf16>
    %c0_1 = arith.constant 0 : index
    %c0_2 = arith.constant 0 : index
    %1 = vector.load %arg2[%c0_1, %c0_2] : memref<64x32xbf16, #tpu.memory_space<vmem>>, vector<64x32xbf16>
    %cst = arith.constant dense<0.000000e+00> : vector<32x32xf32>
    %2 = tpu.matmul %0, %1, %cst {dimension_numbers = #tpu.dot_dimension_numbers<[1], [0], [0], [1], [0, 0, 1, 1], [], []>} : vector<32x64xbf16>, vector<64x32xbf16>, vector<32x32xf32> -> vector<32x32xf32>
    %c0_3 = arith.constant 0 : index
    %c0_4 = arith.constant 0 : index
    %3 = vector.load %arg3[%c0_3, %c0_4] : memref<1x32xf32, #tpu.memory_space<vmem>>, vector<1x32xf32>
    %4 = vector.broadcast %3 : vector<1x32xf32> to vector<32x32xf32>
    %5 = arith.addf %2, %4 : vector<32x32xf32>
    %c0_5 = arith.constant 0 : index
    %c0_6 = arith.constant 0 : index
    %6 = vector.load %arg4[%c0_5, %c0_6] : memref<32x32xbf16, #tpu.memory_space<vmem>>, vector<32x32xbf16>
    %7 = arith.extf %6 : vector<32x32xbf16> to vector<32x32xf32>
    %8 = arith.addf %5, %7 : vector<32x32xf32>
    %cst_7 = arith.constant dense<0.000000e+00> : vector<32xf32>
    %9 = vector.multi_reduction <add>, %8, %cst_7 [1] : vector<32x32xf32> to vector<32xf32>
    %10 = vector.shape_cast %9 : vector<32xf32> to vector<32x1xf32>
    %cst_8 = arith.constant 3.200000e+01 : f32
    %11 = vector.broadcast %cst_8 : f32 to vector<32x1xf32>
    %12 = arith.divf %10, %11 : vector<32x1xf32>
    %13 = vector.broadcast %12 : vector<32x1xf32> to vector<32x32xf32>
    %14 = arith.subf %8, %13 : vector<32x32xf32>
    %15 = arith.mulf %14, %14 : vector<32x32xf32>
    %cst_9 = arith.constant dense<0.000000e+00> : vector<32xf32>
    %16 = vector.multi_reduction <add>, %15, %cst_9 [1] : vector<32x32xf32> to vector<32xf32>
    %17 = vector.shape_cast %16 : vector<32xf32> to vector<32x1xf32>
    %cst_10 = arith.constant 3.200000e+01 : f32
    %18 = vector.broadcast %cst_10 : f32 to vector<32x1xf32>
    %19 = arith.divf %17, %18 : vector<32x1xf32>
    %20 = vector.broadcast %12 : vector<32x1xf32> to vector<32x32xf32>
    %21 = arith.subf %8, %20 : vector<32x32xf32>
    %cst_11 = arith.constant 9.99999996E-13 : f32
    %22 = vector.broadcast %cst_11 : f32 to vector<32x1xf32>
    %23 = arith.addf %19, %22 : vector<32x1xf32>
    %24 = math.rsqrt %23 : vector<32x1xf32>
    %25 = vector.broadcast %24 : vector<32x1xf32> to vector<32x32xf32>
    %26 = arith.mulf %21, %25 : vector<32x32xf32>
    %c0_12 = arith.constant 0 : index
    %c0_13 = arith.constant 0 : index
    %27 = vector.load %arg5[%c0_12, %c0_13] : memref<1x32xf32, #tpu.memory_space<vmem>>, vector<1x32xf32>
    %28 = vector.broadcast %27 : vector<1x32xf32> to vector<32x32xf32>
    %29 = arith.mulf %26, %28 : vector<32x32xf32>
    %c0_14 = arith.constant 0 : index
    %c0_15 = arith.constant 0 : index
    %30 = vector.load %arg6[%c0_14, %c0_15] : memref<1x32xf32, #tpu.memory_space<vmem>>, vector<1x32xf32>
    %31 = vector.broadcast %30 : vector<1x32xf32> to vector<32x32xf32>
    %32 = arith.addf %29, %31 : vector<32x32xf32>
    %33 = arith.truncf %32 : vector<32x32xf32> to vector<32x32xbf16>
    %c0_16 = arith.constant 0 : index
    %c0_17 = arith.constant 0 : index
    %34 = vector.load %arg7[%c0_16, %c0_17] : memref<32x32xbf16, #tpu.memory_space<vmem>>, vector<32x32xbf16>
    tpu.vector_store %arg7[%c0_16, %c0_17], %33 {strides = array<i32>} : memref<32x32xbf16, #tpu.memory_space<vmem>>, vector<32x32xbf16>,
    return
  }
  func.func @transform_0(%arg0: i32) -> (i32, i32) {
    %c0_i32 = arith.constant 0 : i32
    %c0_i32_0 = arith.constant 0 : i32
    return %arg0, %c0_i32 : i32, i32
  }
  func.func @transform_1(%arg0: i32) -> (i32, i32) {
    %c0_i32 = arith.constant 0 : i32
    %c0_i32_0 = arith.constant 0 : i32
    %c0_i32_1 = arith.constant 0 : i32
    return %c0_i32, %c0_i32_0 : i32, i32
  }
  func.func @transform_2(%arg0: i32) -> (i32, i32) {
    %c0_i32 = arith.constant 0 : i32
    %c0_i32_0 = arith.constant 0 : i32
    %c0_i32_1 = arith.constant 0 : i32
    return %c0_i32, %c0_i32_0 : i32, i32
  }
  func.func @transform_3(%arg0: i32) -> (i32, i32) {
    %c0_i32 = arith.constant 0 : i32
    %c0_i32_0 = arith.constant 0 : i32
    return %arg0, %c0_i32 : i32, i32
  }
  func.func @transform_4(%arg0: i32) -> (i32, i32) {
    %c0_i32 = arith.constant 0 : i32
    %c0_i32_0 = arith.constant 0 : i32
    %c0_i32_1 = arith.constant 0 : i32
    return %c0_i32, %c0_i32_0 : i32, i32
  }
  func.func @transform_5(%arg0: i32) -> (i32, i32) {
    %c0_i32 = arith.constant 0 : i32
    %c0_i32_0 = arith.constant 0 : i32
    %c0_i32_1 = arith.constant 0 : i32
    return %c0_i32, %c0_i32_0 : i32, i32
  }
  func.func @transform_6(%arg0: i32) -> (i32, i32) {
    %c0_i32 = arith.constant 0 : i32
    %c0_i32_0 = arith.constant 0 : i32
    return %arg0, %c0_i32 : i32, i32
  }
}

module attributes {stable_mosaic.version = 11 : i64} {
  func.func @_pool_kernel(%arg0: i32, %arg1: memref<1x8x32xbf16, #tpu.memory_space<vmem>>, %arg2: memref<1x1x32xf32, #tpu.memory_space<vmem>>) attributes {dimension_semantics = [#tpu.dimension_semantics<parallel>], iteration_bounds = array<i64: 4>, scalar_prefetch = 0 : i64, scratch_operands = 0 : i64, tpu.core_type = #tpu.core_type<tc>, window_params = [{transform_indices = @transform_0, window_bounds = array<i64: 1, 8, 32>}, {transform_indices = @transform_1, window_bounds = array<i64: 1, 1, 32>}]} {
    %c0 = arith.constant 0 : index
    %c0_0 = arith.constant 0 : index
    %c0_1 = arith.constant 0 : index
    %0 = vector.load %arg1[%c0, %c0_0, %c0_1] : memref<1x8x32xbf16, #tpu.memory_space<vmem>>, vector<1x8x32xbf16>
    %1 = arith.extf %0 : vector<1x8x32xbf16> to vector<1x8x32xf32>
    %cst = arith.constant dense<0.000000e+00> : vector<1x32xf32>
    %2 = vector.multi_reduction <add>, %1, %cst [1] : vector<1x8x32xf32> to vector<1x32xf32>
    %3 = vector.shape_cast %2 : vector<1x32xf32> to vector<1x1x32xf32>
    %cst_2 = arith.constant 8.000000e+00 : f32
    %4 = vector.broadcast %cst_2 : f32 to vector<1x1x32xf32>
    %5 = arith.divf %3, %4 : vector<1x1x32xf32>
    %c0_3 = arith.constant 0 : index
    %c0_4 = arith.constant 0 : index
    %c0_5 = arith.constant 0 : index
    %6 = vector.load %arg2[%c0_3, %c0_4, %c0_5] : memref<1x1x32xf32, #tpu.memory_space<vmem>>, vector<1x1x32xf32>
    tpu.vector_store %arg2[%c0_3, %c0_4, %c0_5], %5 {strides = array<i32>} : memref<1x1x32xf32, #tpu.memory_space<vmem>>, vector<1x1x32xf32>,
    return
  }
  func.func @transform_0(%arg0: i32) -> (i32, i32, i32) {
    %c0_i32 = arith.constant 0 : i32
    %c0_i32_0 = arith.constant 0 : i32
    %c0_i32_1 = arith.constant 0 : i32
    return %arg0, %c0_i32, %c0_i32_0 : i32, i32, i32
  }
  func.func @transform_1(%arg0: i32) -> (i32, i32, i32) {
    %c0_i32 = arith.constant 0 : i32
    %c0_i32_0 = arith.constant 0 : i32
    %c0_i32_1 = arith.constant 0 : i32
    return %arg0, %c0_i32, %c0_i32_0 : i32, i32, i32
  }
}

</mosaic_0001>

<bundles_post_ra>
// kernel: model_forward.12
= control target key start
LH: loop header
LB: loop body
LE: loop exit
PB: predicated region body
PF: predicated region fallthrough
CT: control target
= control target key end

     0   :  { %8 = vsyncpa [#allocation3], 0  ;;  %s386_s0 = inlined_call_operand.hbm [shape: f32[32,32], index: 0, kind: input, shape index: {}]   ;;  %s387_s1 = inlined_call_operand.hbm [shape: f32[1,32], index: 1, kind: input, shape index: {}]   ;;  %s388_s2 = inlined_call_operand.hbm [shape: f32[1,32], index: 2, kind: input, shape index: {}]   ;;  %s389_s3 = inlined_call_operand.hbm [shape: bf16[32,32], index: 3, kind: output, shape index: {}]  }
   0x1   :  { %9 = vsyncpa [#allocation6], 0 }
   0x2   :  { %10 = vsyncpa [#allocation4], 0  ;;  %s291_s12 = smov [#allocation5]   ;;  %s292_s14 = smov [#allocation2]  }
   0x3   :  { %s29_s13 = sshll.u32 %s291_s12, 4  ;;  %s16_s15 = sshll.u32 %s292_s14, 4  ;;  %s30_s13 = int_to_ptr.vmem [resolvable:$true] %s29_s13  ;;  %s319_s15 = int_to_ptr.vmem [resolvable:$true] %s16_s15 }
   0x4   :  { %s197_s18 = scalar_lea.hbm %s387_s1, 16 }
   0x5   :  { %p198_p0 = scmp.ne.s32.totalorder %s387_s1, %s197_s18  ;;  %p201_p1 = scmp.lt.u32.totalorder %s197_s18, %s387_s1 }
   0x7   :  { %p203_p2 = pnand %p201_p1, %p198_p0 }
   0x9   :  { %206 = shalt.err (!%p203_p2)
}
   0xa   :  { %s207_s23 = scalar_lea.vmem %s30_s13, 16  ;;  %s211_s24 = scalar_lea.vmem %s30_s13, 32 }
   0xb   :  { %p208_p3 = scmp.ne.s32.totalorder %s30_s13, %s207_s23  ;;  %p212_p4 = scmp.lt.s32.totalorder %s30_s13, %s30_s13 }
   0xc   :  { %p213_p5 = scmp.lt.s32.totalorder %s211_s24, %s207_s23 }
   0xe   :  { %p214_p6 = por %p213_p5, %p212_p4 }
  0x10   :  { %p215_p7 = pnand %p214_p6, %p208_p3 }
  0x12   :  { %218 = shalt.err (!%p215_p7)
}
  0x13   :  { %32 = dma.hbm_to_vmem [thread:$0]  %s387_s1, 16, %s30_s13, [#allocation6]  }
  0x14   :  { %s219_s29 = scalar_lea.hbm %s386_s0, 512 }
  0x15   :  { %p220_p8 = scmp.ne.s32.totalorder %s386_s0, %s219_s29  ;;  %p223_p9 = scmp.lt.u32.totalorder %s219_s29, %s386_s0 }
  0x17   :  { %p225_p10 = pnand %p223_p9, %p220_p8 }
  0x19   :  { %228 = shalt.err (!%p225_p10)
}
  0x1a   :  { %s229_s7 = scalar_lea.vmem %s319_s15, 512  ;;  %p234_p12 = scmp.lt.s32.totalorder %s319_s15, %s319_s15 }
  0x1b   :  { %p230_p11 = scmp.ne.s32.totalorder %s319_s15, %s229_s7  ;;  %p235_p13 = scmp.lt.s32.totalorder %s229_s7, %s229_s7 }
  0x1d   :  { %p236_p0 = por %p235_p13, %p234_p12 }
  0x1f   :  { %p237_p1 = pnand %p236_p0, %p230_p11 }
  0x21   :  { %240 = shalt.err (!%p237_p1)
}
  0x22   :  { %s293_s1 = smov 128   ;;  %s294_s8 = smov 8  }
  0x23   :  { %22 = dma.hbm_to_vmem [thread:$0]  %s386_s0, 512, %s319_s15, [#allocation3], %s293_s1, %s293_s1, %s294_s8  }
  0x24   :  { %s295_s11 = smov [#allocation7]   ;;  %s241_s16 = scalar_lea.hbm %s388_s2, 16 }
  0x25   :  { %s39_s12 = sshll.u32 %s295_s11, 4  ;;  %p242_p2 = scmp.ne.s32.totalorder %s388_s2, %s241_s16  ;;  %s40_s12 = int_to_ptr.vmem [resolvable:$true] %s39_s12 }
  0x26   :  { %p245_p3 = scmp.lt.u32.totalorder %s241_s16, %s388_s2 }
  0x28   :  { %p247_p4 = pnand %p245_p3, %p242_p2 }
  0x2a   :  { %250 = shalt.err (!%p247_p4)
}
  0x2b   :  { %s251_s21 = scalar_lea.vmem %s40_s12, 16  ;;  %s255_s0 = scalar_lea.vmem %s40_s12, 32 }
  0x2c   :  { %p252_p5 = scmp.ne.s32.totalorder %s40_s12, %s251_s21  ;;  %p256_p6 = scmp.lt.s32.totalorder %s40_s12, %s40_s12 }
  0x2d   :  { %p257_p7 = scmp.lt.s32.totalorder %s255_s0, %s251_s21 }
  0x2f   :  { %p258_p8 = por %p257_p7, %p256_p6 }
  0x31   :  { %p259_p9 = pnand %p258_p8, %p252_p5 }
  0x33   :  { %262 = shalt.err (!%p259_p9)
}
  0x34   :  { %42 = dma.hbm_to_vmem [thread:$0]  %s388_s2, 16, %s40_s12, [#allocation6]  }
  0x35   :  { %285 = dma.done.wait [#allocation3], 512  }
  0x36   :  { %286 = vsyncadd [#allocation3], 4294966784 }
  0x37   :  { %287 = dma.done.wait [#allocation6], 32  }
  0x38   :  { %288 = vsyncadd [#allocation6], 4294967264  ;;  %vm56_vm0 = vcmask 261120   ;;  %v52_v0 = vld [vmem:[#allocation2] sm:$0xff]  ;;  %v54_v1 = vld [vmem:[#allocation2 + $0x10] sm:$0xff]  ;;  %vm148_vm1 = vcmask 257024  }
  0x39   :  { %v53_v2 = vld [vmem:[#allocation2 + $0x8] sm:$0xff]  ;;  %v57_v3 = vsel %vm56_vm0, %v52_v0, 0.0  ;;  %v63_v4 = vsel %vm56_vm0, %v54_v1, 0.0  ;;  %v55_v5 = vld [vmem:[#allocation2 + $0x18] sm:$0xff]  ;;  %v171_v41 = vld [vmem:[#allocation5] ss:$0 sm:$0xff] }
  0x3a   :  { %58 = vadd.xlane.f32.xlu0 %v57_v3  ;;  %64 = vadd.xlane.f32.xlu1 %v63_v4  ;;  %v60_v6 = vsel %vm56_vm0, %v53_v2, 0.0  ;;  %v66_v7 = vsel %vm56_vm0, %v55_v5, 0.0  ;;  %v172_v43 = vld [vmem:[#allocation7] ss:$0 sm:$0xff]  ;;  %s296_s2 = smov [#allocation8]  }
  0x3b   :  { %s158_s23 = sshll.u32 %s296_s2, 4  ;;  %s159_s23 = int_to_ptr.vmem [resolvable:$true] %s158_s23 }
  0x3c   :  { %s263_s24 = scalar_lea.vmem %s159_s23, 256  ;;  %p268_p11 = scmp.lt.s32.totalorder %s159_s23, %s159_s23 }
  0x3d   :  { %p264_p10 = scmp.ne.s32.totalorder %s159_s23, %s263_s24  ;;  %p269_p12 = scmp.lt.s32.totalorder %s263_s24, %s263_s24 }
  0x3e   :  { %61 = vadd.xlane.f32.xlu0 %v60_v6  ;;  %67 = vadd.xlane.f32.xlu1 %v66_v7 }
  0x3f   :  { %p270_p13 = por %p269_p12, %p268_p11 }
  0x41   :  { %p271_p0 = pnand %p270_p13, %p264_p10 }
  0xc7   :  { %v59_v8 = vpop.xlane.xlu0 %58  ;;  %v65_v9 = vpop.xlane.xlu1 %64 }
  0xc8   :  { %v70_v10 = vmul.f32 0.03125, %v59_v8  ;;  %v72_v11 = vmul.f32 0.03125, %v65_v9 }
  0xca   :  { %v74_v12 = vsub.f32 %v52_v0, %v70_v10  ;;  %v76_v13 = vsub.f32 %v54_v1, %v72_v11 }
  0xcb   :  { %v62_v14 = vpop.xlane.xlu0 %61  ;;  %v68_v15 = vpop.xlane.xlu1 %67 }
  0xcc   :  { %v71_v16 = vmul.f32 0.03125, %v62_v14  ;;  %v73_v17 = vmul.f32 0.03125, %v68_v15  ;;  %v78_v18 = vmul.f32 %v74_v12, %v74_v12  ;;  %v80_v19 = vmul.f32 %v76_v13, %v76_v13 }
  0xce   :  { %v75_v20 = vsub.f32 %v53_v2, %v71_v16  ;;  %v77_v21 = vsub.f32 %v55_v5, %v73_v17  ;;  %v82_v22 = vsel %vm56_vm0, %v78_v18, 0.0  ;;  %v88_v23 = vsel %vm56_vm0, %v80_v19, 0.0 }
  0xcf   :  { %83 = vadd.xlane.f32.xlu0 %v82_v22 }
  0xd0   :  { %v79_v24 = vmul.f32 %v75_v20, %v75_v20  ;;  %v81_v25 = vmul.f32 %v77_v21, %v77_v21 }
  0xd2   :  { %v85_v26 = vsel %vm56_vm0, %v79_v24, 0.0  ;;  %v91_v27 = vsel %vm56_vm0, %v81_v25, 0.0 }
  0xd3   :  { %89 = vadd.xlane.f32.xlu0 %v88_v23  ;;  %86 = vadd.xlane.f32.xlu1 %v85_v26 }
  0xd7   :  { %92 = vadd.xlane.f32.xlu1 %v91_v27 }
 0x15c   :  { %v84_v28 = vpop.xlane.xlu0 %83 }
 0x15d   :  { %v94_v29 = vmul.f32 0.03125, %v84_v28 }
 0x15f   :  { %v98_v30 = vadd.f32 1e-12, %v94_v29 }
 0x160   :  { %v87_v31 = vpop.xlane.xlu1 %86  ;;  %v90_v32 = vpop.xlane.xlu0 %89 }
 0x161   :  { %189 = vrsqrt.f32 %v98_v30  ;;  %v95_v33 = vmul.f32 0.03125, %v87_v31  ;;  %v96_v34 = vmul.f32 0.03125, %v90_v32 }
 0x163   :  { %v99_v35 = vadd.f32 1e-12, %v95_v33  ;;  %v100_v36 = vadd.f32 1e-12, %v96_v34 }
 0x164   :  { %v93_v37 = vpop.xlane.xlu1 %92 }
 0x165   :  { %191 = vrsqrt.f32 %v99_v35  ;;  %v97_v38 = vmul.f32 0.03125, %v93_v37 }
 0x166   :  { %193 = vrsqrt.f32 %v100_v36 }
 0x167   :  { %v101_v39 = vadd.f32 1e-12, %v97_v38 }
 0x169   :  { %195 = vrsqrt.f32 %v101_v39 }
 0x16b   :  { %v190_v40 = vpop.eup %189 }
 0x16c   :  { %v106_v42 = vmul.f32 %v190_v40, %v74_v12 }
 0x16e   :  { %v117_v44 = vmul.f32 %v171_v41, %v106_v42 }
 0x16f   :  { %v192_v45 = vpop.eup %191 }
 0x170   :  { %v194_v46 = vpop.eup %193  ;;  %v128_v47 = vadd.f32 %v172_v43, %v117_v44  ;;  %v107_v48 = vmul.f32 %v192_v45, %v75_v20 }
 0x171   :  { %v108_v49 = vmul.f32 %v194_v46, %v76_v13 }
 0x172   :  { %v177_v50 = vpack.c.bf16 %v128_v47, %v128_v47  ;;  %v118_v51 = vmul.f32 %v171_v41, %v107_v48 }
 0x173   :  { %v196_v52 = vpop.eup %195  ;;  %v119_v53 = vmul.f32 %v171_v41, %v108_v49 }
 0x174   :  { %v129_v54 = vadd.f32 %v172_v43, %v118_v51  ;;  %v109_v55 = vmul.f32 %v196_v52, %v77_v21  ;;  %149 = vst.msk [vmem:[#allocation8] sm:$0xf] %vm148_vm1, %v177_v50 }
 0x175   :  { %v130_v56 = vadd.f32 %v172_v43, %v119_v53 }
 0x176   :  { %v178_v57 = vpack.c.bf16 %v129_v54, %v129_v54  ;;  %v120_v58 = vmul.f32 %v171_v41, %v109_v55 }
 0x177   :  { %v179_v59 = vpack.c.bf16 %v130_v56, %v130_v56 }
 0x178   :  { %v131_v60 = vadd.f32 %v172_v43, %v120_v58  ;;  %150 = vst.msk [vmem:[#allocation8 + $0x4] sm:$0xf] %vm148_vm1, %v178_v57 }
 0x179   :  { %151 = vst.msk [vmem:[#allocation8 + $0x8] sm:$0xf] %vm148_vm1, %v179_v59 }
 0x17a   :  { %v180_v61 = vpack.c.bf16 %v131_v60, %v131_v60 }
 0x17c   :  { %152 = vst.msk [vmem:[#allocation8 + $0xc] sm:$0xf] %vm148_vm1, %v180_v61 }
 0x17d   :  { %274 = shalt.err (!%p271_p0)
}
 0x17e   :  { %s275_s27 = scalar_lea.hbm %s389_s3, 256 }
 0x17f   :  { %p276_p1 = scmp.ne.s32.totalorder %s389_s3, %s275_s27  ;;  %p279_p2 = scmp.lt.u32.totalorder %s275_s27, %s389_s3 }
 0x181   :  { %p281_p3 = pnand %p279_p2, %p276_p1 }
 0x183   :  { %284 = shalt.err (!%p281_p3)
}
 0x184   :  { %s297_s5 = smov 64   ;;  %s298_s6 = smov 4  }
 0x185   :  { %164 = dma.vmem_to_hbm [thread:$0]  %s159_s23, 256, %s389_s3, [#allocation4], %s297_s5, %s297_s5, %s298_s6  }
 0x186   :  { %289 = dma.done.wait [#allocation4], 256  }
 0x187   :  { %290 = vsyncadd [#allocation4], 4294967040 }
 0x188   :  { %168 = vsyncpa [#allocation3], 1 }
 0x189   :  { %169 = vsyncpa [#allocation6], 1 }
 0x18a   :  { %170 = vsyncpa [#allocation4], 1 }

// kernel: model_forward.13
= control target key start
LH: loop header
LB: loop body
LE: loop exit
PB: predicated region body
PF: predicated region fallthrough
CT: control target
= control target key end

     0   :  { %8 = vsyncpa [#allocation3], 0  ;;  %s412_s0 = inlined_call_operand.hbm [shape: bf16[32,32], index: 0, kind: input, shape index: {}]   ;;  %s413_s1 = inlined_call_operand.hbm [shape: bf16[32,96], index: 1, kind: input, shape index: {}]   ;;  %s414_s2 = inlined_call_operand.hbm [shape: f32[1,96], index: 2, kind: input, shape index: {}]   ;;  %s415_s3 = inlined_call_operand.hbm [shape: bf16[32,96], index: 3, kind: output, shape index: {}]  }
   0x1   :  { %9 = vsyncpa [#allocation6], 0 }
   0x2   :  { %10 = vsyncpa [#allocation4], 0  ;;  %s318_s12 = smov [#allocation5]   ;;  %s319_s14 = smov [#allocation2]  }
   0x3   :  { %s28_s13 = sshll.u32 %s318_s12, 4  ;;  %s16_s15 = sshll.u32 %s319_s14, 4  ;;  %s29_s13 = int_to_ptr.vmem [resolvable:$true] %s28_s13  ;;  %s344_s15 = int_to_ptr.vmem [resolvable:$true] %s16_s15 }
   0x4   :  { %s224_s18 = scalar_lea.hbm %s413_s1, 256 }
   0x5   :  { %p225_p0 = scmp.ne.s32.totalorder %s413_s1, %s224_s18  ;;  %p228_p1 = scmp.lt.u32.totalorder %s224_s18, %s413_s1 }
   0x7   :  { %p230_p2 = pnand %p228_p1, %p225_p0 }
   0x9   :  { %233 = shalt.err (!%p230_p2)
}
   0xa   :  { %s234_s23 = scalar_lea.vmem %s29_s13, 256  ;;  %p239_p4 = scmp.lt.s32.totalorder %s29_s13, %s29_s13 }
   0xb   :  { %p235_p3 = scmp.ne.s32.totalorder %s29_s13, %s234_s23  ;;  %p240_p5 = scmp.lt.s32.totalorder %s234_s23, %s234_s23 }
   0xd   :  { %p241_p6 = por %p240_p5, %p239_p4 }
   0xf   :  { %p242_p7 = pnand %p241_p6, %p235_p3 }
  0x11   :  { %245 = shalt.err (!%p242_p7)
}
  0x12   :  { %s320_s24 = smov 64   ;;  %s321_s25 = smov 4  }
  0x13   :  { %34 = dma.hbm_to_vmem [thread:$0]  %s413_s1, 256, %s29_s13, [#allocation6], %s320_s24, %s320_s24, %s321_s25  }
  0x14   :  { %s246_s30 = scalar_lea.hbm %s412_s0, 256 }
  0x15   :  { %p247_p8 = scmp.ne.s32.totalorder %s412_s0, %s246_s30  ;;  %p250_p9 = scmp.lt.u32.totalorder %s246_s30, %s412_s0 }
  0x17   :  { %p252_p10 = pnand %p250_p9, %p247_p8 }
  0x19   :  { %255 = shalt.err (!%p252_p10)
}
  0x1a   :  { %s256_s8 = scalar_lea.vmem %s344_s15, 256  ;;  %p261_p12 = scmp.lt.s32.totalorder %s344_s15, %s344_s15 }
  0x1b   :  { %p257_p11 = scmp.ne.s32.totalorder %s344_s15, %s256_s8  ;;  %p262_p13 = scmp.lt.s32.totalorder %s256_s8, %s256_s8 }
  0x1d   :  { %p263_p0 = por %p262_p13, %p261_p12 }
  0x1f   :  { %p264_p1 = pnand %p263_p0, %p257_p11 }
  0x21   :  { %267 = shalt.err (!%p264_p1)
}
  0x22   :  { %22 = dma.hbm_to_vmem [thread:$0]  %s412_s0, 256, %s344_s15, [#allocation3], %s320_s24, %s320_s24, %s321_s25  }
  0x23   :  { %s322_s10 = smov [#allocation7]   ;;  %s268_s14 = scalar_lea.hbm %s414_s2, 16 }
  0x24   :  { %s41_s11 = sshll.u32 %s322_s10, 4  ;;  %p269_p2 = scmp.ne.s32.totalorder %s414_s2, %s268_s14  ;;  %s42_s11 = int_to_ptr.vmem [resolvable:$true] %s41_s11 }
  0x25   :  { %p272_p3 = scmp.lt.u32.totalorder %s268_s14, %s414_s2 }
  0x27   :  { %p274_p4 = pnand %p272_p3, %p269_p2 }
  0x29   :  { %277 = shalt.err (!%p274_p4)
}
  0x2a   :  { %s278_s20 = scalar_lea.vmem %s42_s11, 16  ;;  %s282_s0 = scalar_lea.vmem %s42_s11, 32 }
  0x2b   :  { %p279_p5 = scmp.ne.s32.totalorder %s42_s11, %s278_s20  ;;  %p283_p6 = scmp.lt.s32.totalorder %s42_s11, %s42_s11 }
  0x2c   :  { %p284_p7 = scmp.lt.s32.totalorder %s282_s0, %s278_s20 }
  0x2e   :  { %p285_p8 = por %p284_p7, %p283_p6 }
  0x30   :  { %p286_p9 = pnand %p285_p8, %p279_p5 }
  0x32   :  { %289 = shalt.err (!%p286_p9)
}
  0x33   :  { %44 = dma.hbm_to_vmem [thread:$0]  %s414_s2, 16, %s42_s11, [#allocation6]  }
  0x34   :  { %312 = dma.done.wait [#allocation3], 256  }
  0x35   :  { %313 = vsyncadd [#allocation3], 4294967040 }
  0x36   :  { %314 = dma.done.wait [#allocation6], 272  }
  0x37   :  { %315 = vsyncadd [#allocation6], 4294967024  ;;  %v220_v0 = vld [vmem:[#allocation5] sm:$0xff]   ;;  %v221_v1 = vld [vmem:[#allocation5 + $0x8] sm:$0xff]   ;;  %vm92_vm0 = vcmask 261120   ;;  %vm164_vm1 = vcmask 781312  }
  0x38   :  { %206 = vmatprep.subr.bf16.mxu0 %v220_v0  ;;  %v222_v2 = vld [vmem:[#allocation2] sm:$0xff]   ;;  %v223_v3 = vld [vmem:[#allocation2 + $0x8] sm:$0xff]   ;;  %s323_s2 = smov [#allocation8]  }
  0x39   :  { %207 = vmatpush3.bf16.msra.mxu0 %v220_v0  ;;  %210 = vmatprep.mubr.msk.bf16.mxu0 %vm92_vm0, %v222_v2  ;;  %v187_v4 = vld [vmem:[#allocation7] ss:$0 sm:$0xff]  ;;  %s174_s22 = sshll.u32 %s323_s2, 4  ;;  %s175_s22 = int_to_ptr.vmem [resolvable:$true] %s174_s22 }
  0x3a   :  { %208 = vmatprep.subr.bf16.mxu0 %v221_v1  ;;  %s290_s23 = scalar_lea.vmem %s175_s22, 256  ;;  %p295_p11 = scmp.lt.s32.totalorder %s175_s22, %s175_s22 }
  0x3b   :  { %p291_p10 = scmp.ne.s32.totalorder %s175_s22, %s290_s23  ;;  %p296_p12 = scmp.lt.s32.totalorder %s290_s23, %s290_s23 }
  0x3d   :  { %209 = vmatpush3.bf16.msra.mxu0 %v221_v1  ;;  %p297_p13 = por %p296_p12, %p295_p11 }
  0x3f   :  { %p298_p0 = pnand %p297_p13, %p291_p10 }
  0x40   :  { %211 = vmatmul.mubr.msk.bf16.vlgmr.msra.gmra.mrb[0].mxu0 %vm92_vm0, %v223_v3 }
 0x113   :  { %v212_v5 = vpop.f32.mrb[0].mxu0 }
 0x114   :  { %v142_v6 = vadd.f32 %v212_v5, %v187_v4  ;;  %v133_v7 = vpop.f32.mrb[1].mxu0 }
 0x115   :  { %v134_v8 = vadd.f32 %v187_v4, %v133_v7  ;;  %v213_v9 = vpop.f32.mrb[2].mxu0 }
 0x116   :  { %v200_v10 = vpack.c.bf16 %v142_v6, %v142_v6  ;;  %v145_v11 = vadd.f32 %v213_v9, %v187_v4  ;;  %v136_v12 = vpop.f32.mrb[3].mxu0 }
 0x117   :  { %v198_v13 = vpack.c.bf16 %v134_v8, %v134_v8  ;;  %v137_v14 = vadd.f32 %v187_v4, %v136_v12 }
 0x118   :  { %167 = vst.msk [vmem:[#allocation8 + $0x8] sm:$0xf] %vm164_vm1, %v200_v10  ;;  %v201_v15 = vpack.c.bf16 %v145_v11, %v145_v11 }
 0x119   :  { %165 = vst.msk [vmem:[#allocation8] sm:$0xf] %vm164_vm1, %v198_v13  ;;  %v199_v16 = vpack.c.bf16 %v137_v14, %v137_v14 }
 0x11a   :  { %168 = vst.msk [vmem:[#allocation8 + $0xc] sm:$0xf] %vm164_vm1, %v201_v15 }
 0x11b   :  { %166 = vst.msk [vmem:[#allocation8 + $0x4] sm:$0xf] %vm164_vm1, %v199_v16 }
 0x11c   :  { %301 = shalt.err (!%p298_p0)
}
 0x11d   :  { %s302_s28 = scalar_lea.hbm %s415_s3, 256 }
 0x11e   :  { %p303_p1 = scmp.ne.s32.totalorder %s415_s3, %s302_s28  ;;  %p306_p2 = scmp.lt.u32.totalorder %s302_s28, %s415_s3 }
 0x120   :  { %p308_p3 = pnand %p306_p2, %p303_p1 }
 0x122   :  { %311 = shalt.err (!%p308_p3)
}
 0x123   :  { %180 = dma.vmem_to_hbm [thread:$0]  %s175_s22, 256, %s415_s3, [#allocation4], %s320_s24, %s320_s24, %s321_s25  }
 0x124   :  { %316 = dma.done.wait [#allocation4], 256  }
 0x125   :  { %317 = vsyncadd [#allocation4], 4294967040 }
 0x126   :  { %184 = vsyncpa [#allocation3], 1 }
 0x127   :  { %185 = vsyncpa [#allocation6], 1 }
 0x128   :  { %186 = vsyncpa [#allocation4], 1 }

// kernel: model_forward.15
= control target key start
LH: loop header
LB: loop body
LE: loop exit
PB: predicated region body
PF: predicated region fallthrough
CT: control target
= control target key end

     0   :  { %11 = vsyncpa [#allocation3], 0  ;;  %s706_s0 = inlined_call_operand.hbm [shape: bf16[32,32], index: 0, kind: input, shape index: {}]   ;;  %s707_s1 = inlined_call_operand.hbm [shape: bf16[32,32], index: 1, kind: input, shape index: {}]   ;;  %s708_s2 = inlined_call_operand.hbm [shape: f32[1,32], index: 2, kind: input, shape index: {}]   ;;  %s709_s3 = inlined_call_operand.hbm [shape: bf16[32,32], index: 3, kind: input, shape index: {}]   ;;  %s710_s4 = inlined_call_operand.hbm [shape: f32[1,32], index: 4, kind: input, shape index: {}]   ;;  %s711_s5 = inlined_call_operand.hbm [shape: f32[1,32], index: 5, kind: input, shape index: {}]   ;;  %s712_s6 = inlined_call_operand.hbm [shape: bf16[32,32], index: 6, kind: output, shape index: {}]  }
   0x1   :  { %12 = vsyncpa [#allocation6], 0 }
   0x2   :  { %13 = vsyncpa [#allocation9], 0 }
   0x3   :  { %14 = vsyncpa [#allocation12], 0 }
   0x4   :  { %15 = vsyncpa [#allocation4], 0  ;;  %s545_s21 = smov [#allocation5]   ;;  %s546_s23 = smov [#allocation8]  }
   0x5   :  { %s33_s22 = sshll.u32 %s545_s21, 4  ;;  %s55_s24 = sshll.u32 %s546_s23, 4  ;;  %s34_s22 = int_to_ptr.vmem [resolvable:$true] %s33_s22  ;;  %s589_s24 = int_to_ptr.vmem [resolvable:$true] %s55_s24 }
   0x6   :  { %s381_s27 = scalar_lea.hbm %s707_s1, 256 }
   0x7   :  { %p382_p0 = scmp.ne.s32.totalorder %s707_s1, %s381_s27  ;;  %p385_p1 = scmp.lt.u32.totalorder %s381_s27, %s707_s1 }
   0x9   :  { %p387_p2 = pnand %p385_p1, %p382_p0 }
   0xb   :  { %390 = shalt.err (!%p387_p2)
}
   0xc   :  { %s391_s8 = scalar_lea.vmem %s34_s22, 256  ;;  %p396_p4 = scmp.lt.s32.totalorder %s34_s22, %s34_s22 }
   0xd   :  { %p392_p3 = scmp.ne.s32.totalorder %s34_s22, %s391_s8  ;;  %p397_p5 = scmp.lt.s32.totalorder %s391_s8, %s391_s8 }
   0xf   :  { %p398_p6 = por %p397_p5, %p396_p4 }
  0x11   :  { %p399_p7 = pnand %p398_p6, %p392_p3 }
  0x13   :  { %402 = shalt.err (!%p399_p7)
}
  0x14   :  { %s547_s9 = smov 64   ;;  %s548_s10 = smov 4  }
  0x15   :  { %39 = dma.hbm_to_vmem [thread:$0]  %s707_s1, 256, %s34_s22, [#allocation6], %s547_s9, %s547_s9, %s548_s10  }
  0x16   :  { %s403_s15 = scalar_lea.hbm %s709_s3, 256 }
  0x17   :  { %p404_p8 = scmp.ne.s32.totalorder %s709_s3, %s403_s15  ;;  %p407_p9 = scmp.lt.u32.totalorder %s403_s15, %s709_s3 }
  0x19   :  { %p409_p10 = pnand %p407_p9, %p404_p8 }
  0x1b   :  { %412 = shalt.err (!%p409_p10)
}
  0x1c   :  { %s413_s20 = scalar_lea.vmem %s589_s24, 256  ;;  %p418_p12 = scmp.lt.s32.totalorder %s589_s24, %s589_s24 }
  0x1d   :  { %p414_p11 = scmp.ne.s32.totalorder %s589_s24, %s413_s20  ;;  %p419_p13 = scmp.lt.s32.totalorder %s413_s20, %s413_s20 }
  0x1f   :  { %p420_p0 = por %p419_p13, %p418_p12 }
  0x21   :  { %p421_p1 = pnand %p420_p0, %p414_p11 }
  0x23   :  { %424 = shalt.err (!%p421_p1)
}
  0x24   :  { %61 = dma.hbm_to_vmem [thread:$0]  %s709_s3, 256, %s589_s24, [#allocation9], %s547_s9, %s547_s9, %s548_s10  }
  0x25   :  { %s549_s22 = smov [#allocation2]   ;;  %s550_s25 = smov [#allocation7]  }
  0x26   :  { %s21_s23 = sshll.u32 %s549_s22, 4  ;;  %s46_s26 = sshll.u32 %s550_s25, 4  ;;  %s22_s23 = int_to_ptr.vmem [resolvable:$true] %s21_s23  ;;  %s47_s26 = int_to_ptr.vmem [resolvable:$true] %s46_s26 }
  0x27   :  { %s425_s29 = scalar_lea.hbm %s706_s0, 256 }
  0x28   :  { %p426_p2 = scmp.ne.s32.totalorder %s706_s0, %s425_s29  ;;  %p429_p3 = scmp.lt.u32.totalorder %s425_s29, %s706_s0 }
  0x2a   :  { %p431_p4 = pnand %p429_p3, %p426_p2 }
  0x2c   :  { %434 = shalt.err (!%p431_p4)
}
  0x2d   :  { %s435_s3 = scalar_lea.vmem %s22_s23, 256  ;;  %p440_p6 = scmp.lt.s32.totalorder %s22_s23, %s22_s23 }
  0x2e   :  { %p436_p5 = scmp.ne.s32.totalorder %s22_s23, %s435_s3  ;;  %p441_p7 = scmp.lt.s32.totalorder %s435_s3, %s435_s3 }
  0x30   :  { %p442_p8 = por %p441_p7, %p440_p6 }
  0x32   :  { %p443_p9 = pnand %p442_p8, %p436_p5 }
  0x34   :  { %446 = shalt.err (!%p443_p9)
}
  0x35   :  { %27 = dma.hbm_to_vmem [thread:$0]  %s706_s0, 256, %s22_s23, [#allocation3], %s547_s9, %s547_s9, %s548_s10  }
  0x36   :  { %s447_s15 = scalar_lea.hbm %s708_s2, 16 }
  0x37   :  { %p448_p10 = scmp.ne.s32.totalorder %s708_s2, %s447_s15  ;;  %p451_p11 = scmp.lt.u32.totalorder %s447_s15, %s708_s2 }
  0x39   :  { %p453_p12 = pnand %p451_p11, %p448_p10 }
  0x3b   :  { %456 = shalt.err (!%p453_p12)
}
  0x3c   :  { %s457_s20 = scalar_lea.vmem %s47_s26, 16  ;;  %s461_s1 = scalar_lea.vmem %s47_s26, 32 }
  0x3d   :  { %p458_p13 = scmp.ne.s32.totalorder %s47_s26, %s457_s20  ;;  %p462_p0 = scmp.lt.s32.totalorder %s47_s26, %s47_s26 }
  0x3e   :  { %p463_p1 = scmp.lt.s32.totalorder %s461_s1, %s457_s20 }
  0x40   :  { %p464_p2 = por %p463_p1, %p462_p0 }
  0x42   :  { %p465_p3 = pnand %p464_p2, %p458_p13 }
  0x44   :  { %468 = shalt.err (!%p465_p3)
}
  0x45   :  { %49 = dma.hbm_to_vmem [thread:$0]  %s708_s2, 16, %s47_s26, [#allocation6]  }
  0x46   :  { %s551_s22 = smov [#allocation10]   ;;  %s552_s25 = smov [#allocation11]  }
  0x47   :  { %s68_s23 = sshll.u32 %s551_s22, 4  ;;  %s78_s27 = sshll.u32 %s552_s25, 4  ;;  %s69_s23 = int_to_ptr.vmem [resolvable:$true] %s68_s23  ;;  %s79_s27 = int_to_ptr.vmem [resolvable:$true] %s78_s27 }
  0x48   :  { %s469_s30 = scalar_lea.hbm %s710_s4, 16 }
  0x49   :  { %p470_p4 = scmp.ne.s32.totalorder %s710_s4, %s469_s30  ;;  %p473_p5 = scmp.lt.u32.totalorder %s469_s30, %s710_s4 }
  0x4b   :  { %p475_p6 = pnand %p473_p5, %p470_p4 }
  0x4d   :  { %478 = shalt.err (!%p475_p6)
}
  0x4e   :  { %s479_s2 = scalar_lea.vmem %s69_s23, 16  ;;  %s483_s26 = scalar_lea.vmem %s69_s23, 32 }
  0x4f   :  { %p480_p7 = scmp.ne.s32.totalorder %s69_s23, %s479_s2  ;;  %p484_p8 = scmp.lt.s32.totalorder %s69_s23, %s69_s23 }
  0x50   :  { %p485_p9 = scmp.lt.s32.totalorder %s483_s26, %s479_s2 }
  0x52   :  { %p486_p10 = por %p485_p9, %p484_p8 }
  0x54   :  { %p487_p11 = pnand %p486_p10, %p480_p7 }
  0x56   :  { %490 = shalt.err (!%p487_p11)
}
  0x57   :  { %71 = dma.hbm_to_vmem [thread:$0]  %s710_s4, 16, %s69_s23, [#allocation9]  }
  0x58   :  { %s491_s15 = scalar_lea.hbm %s711_s5, 16 }
  0x59   :  { %p492_p12 = scmp.ne.s32.totalorder %s711_s5, %s491_s15  ;;  %p495_p13 = scmp.lt.u32.totalorder %s491_s15, %s711_s5 }
  0x5b   :  { %p497_p0 = pnand %p495_p13, %p492_p12 }
  0x5d   :  { %500 = shalt.err (!%p497_p0)
}
  0x5e   :  { %s501_s20 = scalar_lea.vmem %s79_s27, 16  ;;  %s505_s1 = scalar_lea.vmem %s79_s27, 32 }
  0x5f   :  { %p502_p1 = scmp.ne.s32.totalorder %s79_s27, %s501_s20  ;;  %p506_p2 = scmp.lt.s32.totalorder %s79_s27, %s79_s27 }
  0x60   :  { %p507_p3 = scmp.lt.s32.totalorder %s505_s1, %s501_s20 }
  0x62   :  { %p508_p4 = por %p507_p3, %p506_p2 }
  0x64   :  { %p509_p5 = pnand %p508_p4, %p502_p1 }
  0x66   :  { %512 = shalt.err (!%p509_p5)
}
  0x67   :  { %81 = dma.hbm_to_vmem [thread:$0]  %s711_s5, 16, %s79_s27, [#allocation12]  }
  0x68   :  { %535 = dma.done.wait [#allocation3], 256  }
  0x69   :  { %536 = vsyncadd [#allocation3], 4294967040 }
  0x6a   :  { %537 = dma.done.wait [#allocation6], 272  }
  0x6b   :  { %538 = vsyncadd [#allocation6], 4294967024 }
  0x6c   :  { %539 = dma.done.wait [#allocation9], 272  }
  0x6d   :  { %540 = vsyncadd [#allocation9], 4294967024 }
  0x6e   :  { %541 = dma.done.wait [#allocation12], 16  }
  0x6f   :  { %542 = vsyncadd [#allocation12], 4294967280  ;;  %v369_v0 = vld [vmem:[#allocation5] sm:$0xff]   ;;  %v370_v1 = vld [vmem:[#allocation5 + $0x8] sm:$0xff]   ;;  %vm138_vm0 = vcmask 261120   ;;  %vm297_vm1 = vcmask 257024  }
  0x70   :  { %352 = vmatprep.subr.bf16.mxu0 %v369_v0  ;;  %v371_v2 = vld [vmem:[#allocation2] sm:$0xff]   ;;  %v372_v3 = vld [vmem:[#allocation2 + $0x8] sm:$0xff]   ;;  %v329_v60 = vld [vmem:[#allocation10] ss:$0 sm:$0xff]  ;;  %s553_s5 = smov [#allocation13]  }
  0x71   :  { %353 = vmatpush3.bf16.msra.mxu0 %v369_v0  ;;  %356 = vmatprep.mubr.msk.bf16.mxu0 %vm138_vm0, %v371_v2  ;;  %v347_v4 = vld [vmem:[#allocation8 + $0x8] sm:$0xff]   ;;  %v340_v5 = vld [vmem:[#allocation8] sm:$0xff]   ;;  %v322_v6 = vld [vmem:[#allocation7] ss:$0 sm:$0xff]  ;;  %s307_s21 = sshll.u32 %s553_s5, 4  ;;  %s308_s21 = int_to_ptr.vmem [resolvable:$true] %s307_s21 }
  0x72   :  { %354 = vmatprep.subr.bf16.mxu0 %v370_v1  ;;  %v345_v7 = vunpack.c.l.bf16 %v347_v4  ;;  %v341_v9 = vunpack.c.l.bf16 %v340_v5  ;;  %v346_v12 = vunpack.c.h.bf16 %v347_v4  ;;  %v342_v15 = vunpack.c.h.bf16 %v340_v5  ;;  %v330_v62 = vld [vmem:[#allocation11] ss:$0 sm:$0xff]  ;;  %s513_s22 = scalar_lea.vmem %s308_s21, 256  ;;  %p518_p7 = scmp.lt.s32.totalorder %s308_s21, %s308_s21 }
  0x73   :  { %p514_p6 = scmp.ne.s32.totalorder %s308_s21, %s513_s22  ;;  %p519_p8 = scmp.lt.s32.totalorder %s513_s22, %s513_s22 }
  0x75   :  { %355 = vmatpush3.bf16.msra.mxu0 %v370_v1  ;;  %p520_p9 = por %p519_p8, %p518_p7 }
  0x77   :  { %p521_p10 = pnand %p520_p9, %p514_p6 }
  0x78   :  { %357 = vmatmul.mubr.msk.bf16.vlgmr.msra.gmra.mrb[0].mxu0 %vm138_vm0, %v372_v3 }
 0x14b   :  { %v358_v8 = vpop.f32.mrb[0].mxu0 }
 0x14c   :  { %v188_v10 = vadd.f32 %v358_v8, %v322_v6  ;;  %v179_v11 = vpop.f32.mrb[1].mxu0 }
 0x14d   :  { %v180_v13 = vadd.f32 %v322_v6, %v179_v11  ;;  %v359_v14 = vpop.f32.mrb[2].mxu0 }
 0x14e   :  { %v191_v16 = vadd.f32 %v359_v14, %v322_v6  ;;  %v182_v17 = vpop.f32.mrb[3].mxu0  ;;  %v204_v18 = vadd.f32 %v345_v7, %v188_v10 }
 0x14f   :  { %v183_v19 = vadd.f32 %v322_v6, %v182_v17  ;;  %v202_v20 = vadd.f32 %v341_v9, %v180_v13 }
 0x150   :  { %v212_v21 = vsel %vm138_vm0, %v204_v18, 0.0  ;;  %v205_v22 = vadd.f32 %v346_v12, %v191_v16 }
 0x151   :  { %213 = vadd.xlane.f32.xlu1 %v212_v21  ;;  %v206_v23 = vsel %vm138_vm0, %v202_v20, 0.0  ;;  %v203_v24 = vadd.f32 %v342_v15, %v183_v19 }
 0x152   :  { %207 = vadd.xlane.f32.xlu0 %v206_v23  ;;  %v215_v25 = vsel %vm138_vm0, %v205_v22, 0.0 }
 0x153   :  { %v209_v26 = vsel %vm138_vm0, %v203_v24, 0.0 }
 0x155   :  { %216 = vadd.xlane.f32.xlu1 %v215_v25 }
 0x156   :  { %210 = vadd.xlane.f32.xlu0 %v209_v26 }
 0x1de   :  { %v214_v27 = vpop.xlane.xlu1 %213 }
 0x1df   :  { %v221_v28 = vmul.f32 0.03125, %v214_v27  ;;  %v208_v29 = vpop.xlane.xlu0 %207 }
 0x1e0   :  { %v219_v30 = vmul.f32 0.03125, %v208_v29 }
 0x1e1   :  { %v225_v31 = vsub.f32 %v204_v18, %v221_v28 }
 0x1e2   :  { %v223_v32 = vsub.f32 %v202_v20, %v219_v30  ;;  %v217_v33 = vpop.xlane.xlu1 %216 }
 0x1e3   :  { %v222_v34 = vmul.f32 0.03125, %v217_v33  ;;  %v211_v35 = vpop.xlane.xlu0 %210  ;;  %v229_v41 = vmul.f32 %v225_v31, %v225_v31 }
 0x1e4   :  { %v220_v36 = vmul.f32 0.03125, %v211_v35  ;;  %v227_v37 = vmul.f32 %v223_v32, %v223_v32 }
 0x1e5   :  { %v226_v38 = vsub.f32 %v205_v22, %v222_v34  ;;  %v237_v43 = vsel %vm138_vm0, %v229_v41, 0.0 }
 0x1e6   :  { %v224_v39 = vsub.f32 %v203_v24, %v220_v36  ;;  %v231_v40 = vsel %vm138_vm0, %v227_v37, 0.0 }
 0x1e7   :  { %232 = vadd.xlane.f32.xlu0 %v231_v40  ;;  %v230_v45 = vmul.f32 %v226_v38, %v226_v38 }
 0x1e8   :  { %v228_v42 = vmul.f32 %v224_v39, %v224_v39 }
 0x1e9   :  { %v240_v46 = vsel %vm138_vm0, %v230_v45, 0.0 }
 0x1ea   :  { %v234_v44 = vsel %vm138_vm0, %v228_v42, 0.0 }
 0x1eb   :  { %238 = vadd.xlane.f32.xlu0 %v237_v43  ;;  %235 = vadd.xlane.f32.xlu1 %v234_v44 }
 0x1ef   :  { %241 = vadd.xlane.f32.xlu1 %v240_v46 }
 0x274   :  { %v233_v47 = vpop.xlane.xlu0 %232 }
 0x275   :  { %v243_v48 = vmul.f32 0.03125, %v233_v47 }
 0x277   :  { %v247_v49 = vadd.f32 1e-12, %v243_v48 }
 0x278   :  { %v236_v50 = vpop.xlane.xlu1 %235  ;;  %v239_v51 = vpop.xlane.xlu0 %238 }
 0x279   :  { %373 = vrsqrt.f32 %v247_v49  ;;  %v244_v52 = vmul.f32 0.03125, %v236_v50  ;;  %v245_v53 = vmul.f32 0.03125, %v239_v51 }
 0x27b   :  { %v248_v54 = vadd.f32 1e-12, %v244_v52  ;;  %v249_v55 = vadd.f32 1e-12, %v245_v53 }
 0x27c   :  { %v242_v56 = vpop.xlane.xlu1 %241 }
 0x27d   :  { %375 = vrsqrt.f32 %v248_v54  ;;  %v246_v57 = vmul.f32 0.03125, %v242_v56 }
 0x27e   :  { %377 = vrsqrt.f32 %v249_v55 }
 0x27f   :  { %v250_v58 = vadd.f32 1e-12, %v246_v57 }
 0x281   :  { %379 = vrsqrt.f32 %v250_v58 }
 0x283   :  { %v374_v59 = vpop.eup %373 }
 0x284   :  { %v255_v61 = vmul.f32 %v374_v59, %v223_v32 }
 0x286   :  { %v266_v63 = vmul.f32 %v329_v60, %v255_v61 }
 0x287   :  { %v376_v0 = vpop.eup %375 }
 0x288   :  { %v378_v1 = vpop.eup %377  ;;  %v256_v2 = vmul.f32 %v376_v0, %v224_v39  ;;  %v277_v3 = vadd.f32 %v330_v62, %v266_v63 }
 0x289   :  { %v257_v4 = vmul.f32 %v378_v1, %v225_v31 }
 0x28a   :  { %v267_v5 = vmul.f32 %v329_v60, %v256_v2  ;;  %v335_v6 = vpack.c.bf16 %v277_v3, %v277_v3 }
 0x28b   :  { %v380_v7 = vpop.eup %379  ;;  %v268_v8 = vmul.f32 %v329_v60, %v257_v4 }
 0x28c   :  { %v258_v9 = vmul.f32 %v380_v7, %v226_v38  ;;  %v278_v10 = vadd.f32 %v330_v62, %v267_v5  ;;  %298 = vst.msk [vmem:[#allocation13] sm:$0xf] %vm297_vm1, %v335_v6 }
 0x28d   :  { %v279_v11 = vadd.f32 %v330_v62, %v268_v8 }
 0x28e   :  { %v269_v12 = vmul.f32 %v329_v60, %v258_v9  ;;  %v336_v13 = vpack.c.bf16 %v278_v10, %v278_v10 }
 0x28f   :  { %v337_v14 = vpack.c.bf16 %v279_v11, %v279_v11 }
 0x290   :  { %v280_v15 = vadd.f32 %v330_v62, %v269_v12  ;;  %299 = vst.msk [vmem:[#allocation13 + $0x4] sm:$0xf] %vm297_vm1, %v336_v13 }
 0x291   :  { %300 = vst.msk [vmem:[#allocation13 + $0x8] sm:$0xf] %vm297_vm1, %v337_v14 }
 0x292   :  { %v338_v16 = vpack.c.bf16 %v280_v15, %v280_v15 }
 0x294   :  { %301 = vst.msk [vmem:[#allocation13 + $0xc] sm:$0xf] %vm297_vm1, %v338_v16 }
 0x295   :  { %524 = shalt.err (!%p521_p10)
}
 0x296   :  { %s525_s27 = scalar_lea.hbm %s712_s6, 256 }
 0x297   :  { %p526_p11 = scmp.ne.s32.totalorder %s712_s6, %s525_s27  ;;  %p529_p12 = scmp.lt.u32.totalorder %s525_s27, %s712_s6 }
 0x299   :  { %p531_p13 = pnand %p529_p12, %p526_p11 }
 0x29b   :  { %534 = shalt.err (!%p531_p13)
}
 0x29c   :  { %313 = dma.vmem_to_hbm [thread:$0]  %s308_s21, 256, %s712_s6, [#allocation4], %s547_s9, %s547_s9, %s548_s10  }
 0x29d   :  { %543 = dma.done.wait [#allocation4], 256  }
 0x29e   :  { %544 = vsyncadd [#allocation4], 4294967040 }
 0x29f   :  { %317 = vsyncpa [#allocation3], 1 }
 0x2a0   :  { %318 = vsyncpa [#allocation6], 1 }
 0x2a1   :  { %319 = vsyncpa [#allocation9], 1 }
 0x2a2   :  { %320 = vsyncpa [#allocation12], 1 }
 0x2a3   :  { %321 = vsyncpa [#allocation4], 1 }

// kernel: model_forward.14
= control target key start
LH: loop header
LB: loop body
LE: loop exit
PB: predicated region body
PF: predicated region fallthrough
CT: control target
= control target key end

     0   :  { %7 = vsyncpa [#allocation3], 0  ;;  %s1369_s0 = inlined_call_operand.hbm [shape: bf16[4,8,96], index: 0, kind: input, shape index: {}]   ;;  %s1370_s1 = inlined_call_operand.hbm [shape: f32[4,1,8], index: 1, kind: input, shape index: {}]   ;;  %s1371_s2 = inlined_call_operand.hbm [shape: bf16[4,8,32], index: 2, kind: output, shape index: {}]  }
   0x1   :  { %9 = vsyncpa [#allocation3 + $0x1], 0 }
   0x2   :  { %10 = vsyncpa [#allocation6], 0 }
   0x3   :  { %12 = vsyncpa [#allocation6 + $0x1], 0 }
   0x4   :  { %13 = vsyncpa [#allocation4], 0 }
   0x5   :  { %15 = vsyncpa [#allocation4 + $0x1], 0  ;;  %s1125_s9 = smov 0   ;;  %s1127_s10 = smov 0  }
   0x6   :  { %s1129_s11 = smov 0   ;;  %s1131_s12 = smov 0  }
   0x7   :  { %s1133_s13 = smov 0   ;;  %s1135_s14 = smov 0  }
   0x8 LB: > { %s811_s15 = sadd.s32 4294967295, %s1097_s14   ;;  %s812_s16 = sadd.s32 4294967294, %s1097_s14   ;;  %s1097_s14 = sphi %s1135_s14, %s21_s14   ;;  %s1093_s13 = sphi %s1133_s13, %s1390_s13   ;;  %s1089_s12 = sphi %s1131_s12, %s1389_s12   ;;  %s1085_s11 = sphi %s1129_s11, %s1388_s11   ;;  %s1081_s10 = sphi %s1127_s10, %s1387_s10   ;;  %s1077_s9 = sphi %s1125_s9, %s1386_s9  }
   0x9   : > { %s33_s17 = sadd.s32 1, %s1093_s13  ;;  %s42_s18 = sadd.s32 1, %s1085_s11 }
   0xa   : > { %p35_p0 = scmp.ge.s32.totalorder %s33_s17, 4  ;;  %p49_p1 = scmp.ne.s32.totalorder %s1085_s11, %s1081_s10 }
   0xb   : > { %p50_p2 = scmp.eq.s32.totalorder %s1097_s14, 0  ;;  %p55_p3 = scmp.ne.s32.totalorder %s1081_s10, %s1077_s9 }
   0xc   : > { %s1392_s17 = smov (%p35_p0, %s33_s17), 0  ;;  %p56_p5 = scmp.eq.s32.totalorder %s811_s15, 0 }
   0xd   : > { %p1166_p4 = por %p50_p2, %p49_p1  ;;  %s37_s20 = ssub.s32 %s1093_s13, %s1392_s17 }
   0xe   : > { %p107_p6 = scmp.eq.s32.totalorder %s811_s15, 3  ;;  %p40_p7 = scmp.eq.s32.totalorder %s37_s20, 0 }
   0xf   : > { %p1172_p8 = por %p56_p5, %p55_p3  ;;  %p113_p10 = scmp.eq.s32.totalorder %s812_s16, 3 }
  0x10   : > { %p1176_p9 = por %p107_p6, %p49_p1  ;;  %p883_p12 = scmp.lt.s32.totalorder %s1097_s14, 4 }
  0x11   : > { %s1375_s21 = scalar_select %p1172_p8, 1, 0 }
  0x12   : > { %s1376_s22 = scalar_select %p1176_p9, 1, 0 }
  0x13   : > { %s1181_s23 = scalar_select %p40_p7, %s1085_s11, %s42_s18  }
  0x14   : > { %p1183_p11 = por %p113_p10, %p55_p3  ;;  %s1189_s25 = sand.u32 1, %s1085_s11  }
  0x15   : > { %s815_s26 = sshll.u32 %s1189_s25, 2  ;;  %s816_s27 = sshll.u32 %s1093_s13, 6 }
  0x16   : > { %s1377_s24 = scalar_select %p1183_p11, 1, 0 }
  0x17   : > { %s1196_s30 = scalar_lea.hbm %s1369_s0, %s816_s27  ;;  %s137_s3 = scalar_lea.vmem [#allocation2], %s815_s26 }
  0x18   : > { %s145_s4 = sshll.u32 %s137_s3, 4  ;;  %p1202_p13 = pnand %p883_p12, %p1166_p4  ;;  %s1198_s4 = int_to_ptr.vmem [resolvable:$true] %s145_s4 }
  0x19   : > { %s134_s6 = scalar_lea.sflag [#allocation3], %s1189_s25  ;;  %s951_s7 = scalar_lea.hbm %s1196_s30, 64 }
  0x1a   : > { %p952_p2 = scmp.ne.s32.totalorder %s1196_s30, %s951_s7  ;;  %p953_p3 = pneg %p1202_p13 }
  0x1b   : > { %s956_s16 = scalar_lea.hbm %s1369_s0, 256  ;;  %p957_p4 = scmp.lt.u32.totalorder %s1196_s30, %s1369_s0 }
  0x1c   : > { %p954_p5 = pnand %p953_p3, %p952_p2  ;;  %p958_p7 = scmp.lt.u32.totalorder %s956_s16, %s951_s7 }
  0x1d   : > { %p960_p12 = scmp.lt.u32.totalorder %s951_s7, %s1196_s30 }
  0x1e   : > { %p955_p6 = pneg %p954_p5  ;;  %p959_p10 = por %p958_p7, %p957_p4 }
  0x20   : > { %p961_p0 = por %p960_p12, %p959_p10 }
  0x22   : > { %p962_p1 = pnand %p961_p0, %p955_p6 }
  0x24   : > { %965 = shalt.err (!%p962_p1)
}
  0x25   : > { %s966_s20 = scalar_lea.vmem %s1198_s4, 64  ;;  %s1099_s26 = smov [#allocation2]  }
  0x26   : > { %p967_p2 = scmp.ne.s32.totalorder %s1198_s4, %s966_s20  ;;  %s971_s27 = sshll.u32 %s1099_s26, 4  ;;  %s972_s27 = int_to_ptr.vmem [resolvable:$false] %s971_s27 }
  0x27   : > { %s973_s28 = scalar_lea.vmem %s972_s27, 128  ;;  %p974_p9 = scmp.lt.s32.totalorder %s1198_s4, %s972_s27 }
  0x28   : > { %p969_p5 = pnand %p967_p2, %p953_p3  ;;  %p975_p4 = scmp.lt.s32.totalorder %s973_s28, %s966_s20 }
  0x2a   : > { %p970_p11 = pneg %p969_p5  ;;  %p976_p7 = por %p975_p4, %p974_p9 }
  0x2c   : > { %p977_p10 = pnand %p976_p7, %p970_p11 }
  0x2e   : > { %980 = shalt.err (!%p977_p10)
}
  0x2f   : > { %875 = dma.hbm_to_vmem [thread:$0]  (!%p1202_p13), %s1196_s30, 64, %s1198_s4, %s134_s6  }
  0x30   : > { %p1379_p0 = scmp.lt.s32.totalorder %s1097_s14, 5  ;;  %p1380_p1 = scmp.ge.s32.totalorder %s1097_s14, 1 }
  0x31   : > { %s817_s3 = sshll.u32 %s1093_s13, 4  ;;  %s155_s7 = scalar_lea.vmem [#allocation5], %s1189_s25 }
  0x32   : > { %p1238_p6 = pnand %p1380_p1, %p1379_p0  ;;  %s162_s8 = sshll.u32 %s155_s7, 4  ;;  %s163_s8 = int_to_ptr.vmem [resolvable:$true] %s162_s8 }
  0x33   : > { %s1247_s18 = scalar_lea.hbm %s1370_s1, %s817_s3  ;;  %s153_s30 = scalar_lea.sflag [#allocation6], %s1189_s25 }
  0x34   : > { %s1381_s29 = scalar_select %p1238_p6, 1, 0 }
  0x35   : > { %s981_s4 = scalar_lea.hbm %s1247_s18, 16  ;;  %s986_s20 = scalar_lea.hbm %s1370_s1, 64 }
  0x36   : > { %p982_p9 = scmp.ne.s32.totalorder %s1247_s18, %s981_s4  ;;  %p987_p2 = scmp.lt.u32.totalorder %s1247_s18, %s1370_s1 }
  0x37   : > { %p988_p5 = scmp.lt.u32.totalorder %s986_s20, %s981_s4  ;;  %p990_p7 = scmp.lt.u32.totalorder %s981_s4, %s1247_s18 }
  0x38   : > { %p984_p11 = pnand %p982_p9, %p953_p3 }
  0x39   : > { %p989_p4 = por %p988_p5, %p987_p2 }
  0x3a   : > { %p985_p12 = pneg %p984_p11 }
  0x3b   : > { %p991_p10 = por %p990_p7, %p989_p4 }
  0x3d   : > { %p992_p0 = pnand %p991_p10, %p985_p12 }
  0x3f   : > { %995 = shalt.err (!%p992_p0)
}
  0x40   : > { %s996_s25 = scalar_lea.vmem %s163_s8, 16  ;;  %s1100_s28 = smov [#allocation5]  }
  0x41   : > { %p997_p1 = scmp.ne.s32.totalorder %s163_s8, %s996_s25  ;;  %s1001_s3 = sshll.u32 %s1100_s28, 4  ;;  %s1002_s3 = int_to_ptr.vmem [resolvable:$false] %s1001_s3 }
  0x42   : > { %s1003_s7 = scalar_lea.vmem %s1002_s3, 32  ;;  %p1004_p8 = scmp.lt.s32.totalorder %s163_s8, %s1002_s3 }
  0x43   : > { %p999_p9 = pnand %p997_p1, %p953_p3  ;;  %p1005_p6 = scmp.lt.s32.totalorder %s1003_s7, %s996_s25 }
  0x45   : > { %p1000_p11 = pneg %p999_p9  ;;  %p1006_p2 = por %p1005_p6, %p1004_p8 }
  0x47   : > { %p1007_p5 = pnand %p1006_p2, %p1000_p11 }
  0x49   : > { %1010 = shalt.err (!%p1007_p5)
}
  0x4a   : > { %878 = dma.hbm_to_vmem [thread:$0]  (!%p1202_p13), %s1247_s18, 16, %s163_s8, %s153_s30  }
  0x4b   : > { %p1382_p12 = scmp.ne.s32.totalorder %s1381_s29, 0 }
  0x4c   : > { %s1272_s15 = sand.u32 (!%p1382_p12), 1, %s1081_s10   ;;  %p1383_p8 = scmp.ne.s32.totalorder (!%p1382_p12), %s1375_s21, 0 }
  0x4d   : > { %171 = sbr.rel (%p1382_p12) target bundleno = 1455 (0x5af), region = 28  ;;  %s819_s16 = sshll.u32 (!%p1382_p12), %s1272_s15, 2 }
  0x4e   : > { %s174_s4 = scalar_lea.sflag (!%p1382_p12), [#allocation3], %s1272_s15  ;;  %s177_s6 = scalar_lea.vmem (!%p1382_p12), [#allocation2], %s819_s16 }
  0x54   : > { %1064 = dma.done.wait (%p1383_p8), %s174_s4, 64  }
  0x55   : > { %1066 = vsyncadd (%p1383_p8), %s174_s4, 4294967232  ;;  %s183_s5 = scalar_lea.sflag [#allocation6], %s1272_s15  ;;  %s185_s29 = scalar_lea.vmem [#allocation5], %s1272_s15 }
  0x56   : > { %1068 = dma.done.wait (%p1383_p8), %s183_s5, 16  }
  0x57   : > { %1070 = vsyncadd (%p1383_p8), %s183_s5, 4294967280  ;;  %v211_v0 = vld [vmem:[%s177_s6] sm:$0xf]  ;;  %s1101_s8 = smov 112   ;;  %s1102_s18 = smov 96   ;;  %v1103_v2 = vmov 0.0   ;;  %v576_v56 = vlaneseq }
  0x58   : > { %214 = vrot.lane.b32.xlu0 %v211_v0, %s1101_s8  ;;  %v822_v1 = vcombine.low %v211_v0, %v211_v0  ;;  %842 = vmatprep.subr.bf16.mxu0 %v1103_v2  ;;  %vm1104_vm0 = vmmov 0   ;;  %vm264_vm1 = vcmask 130048   ;;  %v821_v9 = vld [vmem:[%s185_s29] ss:$0 sm:$0xff]  ;;  %vm351_vm2 = vcmask 64512   ;;  %s1105_s21 = smov 64  }
  0x59   : > { %848 = vmatprep.subr.bf16.mxu1 %v1103_v2  ;;  %844 = vmatprep.mubr.msk.bf16.mxu0 %vm1104_vm0, %v1103_v2  ;;  %v1106_v54 = vmov 1983009808   ;;  %v577_v58 = vshrl.u32 %v576_v56, 7  ;;  %v1107_v59 = vmov 1934713408   ;;  %s1108_s30 = smov 16  }
  0x5a   : > { %850 = vmatprep.mubr.msk.bf16.mxu1 %vm1104_vm0, %v1103_v2  ;;  %v574_v55 = vunpack.c.l.s4 %v1106_v54  ;;  %v605_v60 = vunpack.c.l.s4 %v1107_v59  ;;  %s831_s19 = sshll.u32 %s1089_s12, 6  ;;  %s209_s20 = scalar_lea.vmem [#allocation7], %s819_s16  ;;  %vm694_vm3 = vcmask 257024  }
  0x5b   : > { %s711_s26 = sshll.u32 %s209_s20, 4  ;;  %s1321_s28 = scalar_lea.hbm %s1371_s2, %s831_s19  ;;  %s1323_s26 = int_to_ptr.vmem [resolvable:$true] %s711_s26 }
  0x5c   : > { %226 = vrot.lane.b32.xlu0 %v822_v1, %s1102_s18  ;;  %v575_v57 = vunpack.c.0.s8 %v574_v55  ;;  %s697_s12 = scalar_lea.sflag [#allocation4], %s1272_s15  ;;  %s1011_s3 = scalar_lea.vmem %s1323_s26, 64 }
  0x5d   : > { %p1012_p13 = scmp.ne.s32.totalorder %s1323_s26, %s1011_s3  ;;  %p1384_p3 = scmp.ne.s32.totalorder %s1376_s22, 0 }
  0x5e   : > { %v578_v62 = vsub.s32 %v575_v57, %v577_v58  ;;  %s1109_s7 = smov [#allocation7]  }
  0x5f   : > { %p1013_p6 = pnand %p1012_p13, %p1384_p3  ;;  %s1015_s16 = sshll.u32 %s1109_s7, 4  ;;  %s1016_s16 = int_to_ptr.vmem [resolvable:$false] %s1015_s16 }
  0x60   : > { %s1017_s4 = scalar_lea.vmem %s1016_s16, 128  ;;  %p1018_p7 = scmp.lt.s32.totalorder %s1323_s26, %s1016_s16 }
  0x61   : > { %p1014_p4 = pneg %p1013_p6  ;;  %p1019_p10 = scmp.lt.s32.totalorder %s1017_s4, %s1011_s3 }
  0x63   : > { %p1020_p0 = por %p1019_p10, %p1018_p7 }
  0x65   : > { %p1021_p1 = pnand %p1020_p0, %p1014_p4 }
  0xca   : > { %v215_v3 = vpop.permute.xlu0 %214 }
  0xcb   : > { %v823_v4 = vcombine.low %v215_v3, %v215_v3 }
  0xcd   : > { %228 = vrot.lane.b32.xlu1 %v823_v4, %s1102_s18 }
  0xce   : > { %v227_v5 = vpop.permute.xlu0 %226 }
  0xf0   : > { %232 = vxpose.xlu1.c.b16.start.end [1/1] (short) (narrow) %v227_v5, 16 }
 0x13f   : > { %v229_v6 = vpop.permute.xlu1 %228 }
 0x140   : > { %248 = vxpose.xlu0.c.b16.start.end [1/1] (short) (narrow) %v229_v6, 16 }
 0x156   : > { %v240_v7 = vpop.trf.xlu1 }
 0x157   : > { %843 = vmatpush3.bf16.msra.mxu0 %v240_v7 }
 0x158   : > { %854 = vmatprep.subr.bf16.mxu0 %v1103_v2 }
 0x15a   : > { %845 = vmatmul.mubr.msk.bf16.vlgmr.msra.gmra.mrb[0].mxu0 %vm264_vm1, %v211_v0  ;;  %v606_v0 = vunpack.c.0.s8 %v605_v60 }
 0x15b   : > { %856 = vmatprep.mubr.msk.bf16.mxu0 %vm1104_vm0, %v1103_v2 }
 0x15c   : > { %v609_v5 = vsub.s32 %v606_v0, %v577_v58 }
 0x1a6   : > { %v256_v8 = vpop.trf.xlu0 }
 0x1a7   : > { %849 = vmatpush3.bf16.msra.mxu1 %v256_v8 }
 0x1a8   : > { %860 = vmatprep.subr.bf16.mxu1 %v1103_v2 }
 0x1aa   : > { %851 = vmatmul.mubr.msk.bf16.vlgmr.msra.gmra.mrb[0].mxu1 %vm264_vm1, %v215_v3 }
 0x1ab   : > { %862 = vmatprep.mubr.msk.bf16.mxu1 %vm1104_vm0, %v1103_v2 }
 0x22d   : > { %v302_v10 = vpop.f32.mrb[0].mxu0 }
 0x22e   : > { %v303_v11 = vadd.f32 %v821_v9, %v302_v10  ;;  %v846_v12 = vpop.f32.mrb[1].mxu0 }
 0x22f   : > { %v305_v13 = vpop.f32.mrb[2].mxu0 }
 0x230   : > { %v352_v14 = vsel %vm351_vm2, %v303_v11, -inf  ;;  %v847_v15 = vpop.f32.mrb[3].mxu0 }
 0x231   : > { %353 = vmax.xlane.f32.xlu0 %v352_v14 }
 0x247   : > { %376 = vrot.lane.b32.xlu0 %v822_v1, %s1105_s21 }
 0x27d   : > { %v345_v16 = vpop.f32.mrb[0].mxu1 }
 0x27e   : > { %v346_v17 = vadd.f32 %v821_v9, %v345_v16  ;;  %v852_v18 = vpop.f32.mrb[1].mxu1 }
 0x27f   : > { %v348_v19 = vpop.f32.mrb[2].mxu1 }
 0x280   : > { %v853_v20 = vpop.f32.mrb[3].mxu1  ;;  %v355_v21 = vsel %vm351_vm2, %v346_v17, -inf }
 0x281   : > { %356 = vmax.xlane.f32.xlu1 %v355_v21 }
 0x292   : > { %378 = vrot.lane.b32.xlu1 %v823_v4, %s1105_s21 }
 0x2be   : > { %v354_v22 = vpop.xlane.xlu0 %353 }
 0x2bf   : > { %v358_v23 = vsub.f32 %v303_v11, %v354_v22 }
 0x2c1   : > { %v360_v24 = vmul.f32 1.442695, %v358_v23 }
 0x2c2   : > { %v377_v33 = vpop.permute.xlu0 %376 }
 0x2c3   : > { %943 = vpow2.f32 %v360_v24 }
 0x2cd   : > { %v944_v25 = vpop.eup %943 }
 0x2ce   : > { %v364_v26 = vsel %vm351_vm2, %v944_v25, 0.0 }
 0x2cf   : > { %365 = vadd.xlane.f32.xlu1 %v364_v26 }
 0x30e   : > { %v357_v27 = vpop.xlane.xlu1 %356 }
 0x30f   : > { %v359_v28 = vsub.f32 %v346_v17, %v357_v27 }
 0x311   : > { %v362_v29 = vmul.f32 1.442695, %v359_v28 }
 0x312   : > { %v379_v30 = vpop.permute.xlu1 %378 }
 0x313   : > { %945 = vpow2.f32 %v362_v29  ;;  %398 = vxpose.xlu1.c.b16.start.end [1/1] (short) (narrow) %v379_v30, 16 }
 0x31d   : > { %v946_v31 = vpop.eup %945 }
 0x31e   : > { %v367_v32 = vsel %vm351_vm2, %v946_v31, 0.0 }
 0x31f   : > { %368 = vadd.xlane.f32.xlu0 %v367_v32 }
 0x34c   : > { %382 = vxpose.xlu0.c.b16.start.end [1/1] (short) (narrow) %v377_v33, 16 }
 0x35c   : > { %v366_v34 = vpop.xlane.xlu1 %365 }
 0x35d   : > { %947 = vrcp.f32 %v366_v34 }
 0x367   : > { %v948_v35 = vpop.eup %947 }
 0x368   : > { %v372_v36 = vmul.f32 %v948_v35, %v944_v25 }
 0x36a   : > { %v374_v37 = vpack.c.bf16 %v372_v36, %v372_v36 }
 0x36c   : > { %v418_v38 = vsel %vm351_vm2, %v374_v37, 0 }
 0x36d   : > { %855 = vmatpush3.bf16.xpose.msra.mxu0 %v418_v38 }
 0x379   : > { %v406_v45 = vpop.trf.xlu1 }
 0x3ac   : > { %v369_v39 = vpop.xlane.xlu0 %368 }
 0x3ad   : > { %949 = vrcp.f32 %v369_v39 }
 0x3b2   : > { %v390_v40 = vpop.trf.xlu0 }
 0x3b3   : > { %857 = vmatmul.mubr.msk.bf16.vlgmr.msra.gmra.mrb[4].mxu0 %vm351_vm2, %v390_v40 }
 0x3b7   : > { %v950_v41 = vpop.eup %949 }
 0x3b8   : > { %v373_v42 = vmul.f32 %v950_v41, %v946_v31 }
 0x3ba   : > { %v375_v43 = vpack.c.bf16 %v373_v42, %v373_v42 }
 0x3bc   : > { %v465_v44 = vsel %vm351_vm2, %v375_v43, 0 }
 0x3bd   : > { %861 = vmatpush3.bf16.xpose.msra.mxu1 %v465_v44 }
 0x3c4   : > { %863 = vmatmul.mubr.msk.bf16.vlgmr.msra.gmra.mrb[4].mxu1 %vm351_vm2, %v406_v45 }
 0x486   : > { %v454_v46 = vpop.f32.mrb[4].mxu0 }
 0x487   : > { %508 = vxpose.xlu0.b32.start [1/2] (short) (narrow) %v454_v46, 8  ;;  %v858_v47 = vpop.f32.mrb[5].mxu0 }
 0x488   : > { %v457_v48 = vpop.f32.mrb[6].mxu0 }
 0x489   : > { %v859_v49 = vpop.f32.mrb[7].mxu0 }
 0x48b   : > { %509 = vxpose.xlu0.b32.end [2/2] (short) (narrow) %v457_v48, 8 }
 0x497   : > { %v501_v50 = vpop.f32.mrb[4].mxu1 }
 0x498   : > { %540 = vxpose.xlu1.b32.start [1/2] (short) (narrow) %v501_v50, 8  ;;  %v864_v51 = vpop.f32.mrb[5].mxu1 }
 0x499   : > { %v504_v52 = vpop.f32.mrb[6].mxu1 }
 0x49a   : > { %v865_v53 = vpop.f32.mrb[7].mxu1 }
 0x49c   : > { %541 = vxpose.xlu1.b32.end [2/2] (short) (narrow) %v504_v52, 8 }
 0x507   : > { %v524_v61 = vpop.trf.xlu0 }
 0x508   : > { %v572_v63 = vcombine.high %v524_v61, %v1103_v2  ;;  %v579_v1 = vrot.slane %v524_v61, %v578_v62 }
 0x50a   : > { %v586_v4 = vrot.slane %v572_v63, %v578_v62 }
 0x518   : > { %v556_v3 = vpop.trf.xlu1 }
 0x519   : > { %v587_v6 = vcombine.high %v556_v3, %v1103_v2  ;;  %v594_v7 = vrot.slane %v556_v3, %v578_v62 }
 0x51b   : > { %v601_v8 = vrot.slane %v587_v6, %v578_v62  ;;  %v602_v9 = vcombine.low %v579_v1, %v594_v7  ;;  %v603_v10 = vcombine.high %v579_v1, %v594_v7 }
 0x51d   : > { %v610_v11 = vrot.slane %v602_v9, %v609_v5  ;;  %v617_v12 = vrot.slane %v603_v10, %v609_v5  ;;  %v618_v13 = vcombine.low %v586_v4, %v601_v8  ;;  %v619_v14 = vcombine.high %v586_v4, %v601_v8 }
 0x51f   : > { %v626_v15 = vrot.slane %v618_v13, %v609_v5  ;;  %v633_v16 = vrot.slane %v619_v14, %v609_v5  ;;  %v638_v17 = vcombine.low %v610_v11, %v617_v12  ;;  %v828_v18 = vcombine.high %v610_v11, %v617_v12 }
 0x521   : > { %v645_v19 = vrot.slane %v638_v17, %v578_v62  ;;  %v653_v20 = vrot.slane %v828_v18, %v578_v62  ;;  %v654_v21 = vcombine.low %v626_v15, %v633_v16  ;;  %v829_v22 = vcombine.high %v626_v15, %v633_v16 }
 0x523   : > { %v661_v23 = vrot.slane %v654_v21, %v578_v62  ;;  %v669_v2 = vrot.slane %v829_v22, %v578_v62  ;;  %v670_v24 = vcombine.low %v645_v19, %v653_v20 }
 0x525   : > { %v678_v25 = vcombine.low %v661_v23, %v669_v2  ;;  %v677_v26 = vrot.slane %v670_v24, %v609_v5 }
 0x527   : > { %v685_v27 = vrot.slane %v678_v25, %v609_v5 }
 0x529   : > { %v687_v28 = vcombine.high %v677_v26, %v685_v27  ;;  %v686_v29 = vcombine.low %v677_v26, %v685_v27 }
 0x52b   : > { %689 = vrot.lane.b32.xlu0 %v687_v28, %s1108_s30 }
 0x59d   : > { %v690_v30 = vpop.permute.xlu0 %689 }
 0x59e   : > { %v692_v31 = vsel %vm264_vm1, %v686_v29, %v690_v30 }
 0x59f   : > { %v693_v32 = vpack.c.bf16 %v692_v31, %v692_v31 }
 0x5a1   : > { %695 = vst.msk [vmem:[%s209_s20] sm:$0xf] %vm694_vm3, %v693_v32 }
 0x5a2   : > { %1024 = shalt.err (!%p1021_p1)
}
 0x5a3   : > { %s1025_s15 = scalar_lea.hbm %s1321_s28, 64  ;;  %s1029_s29 = scalar_lea.hbm %s1371_s2, 256 }
 0x5a4   : > { %p1026_p9 = scmp.ne.s32.totalorder %s1321_s28, %s1025_s15  ;;  %p1030_p5 = scmp.lt.u32.totalorder %s1321_s28, %s1371_s2 }
 0x5a5   : > { %p1031_p12 = scmp.lt.u32.totalorder %s1029_s29, %s1025_s15  ;;  %p1033_p13 = scmp.lt.u32.totalorder %s1025_s15, %s1321_s28 }
 0x5a6   : > { %p1027_p11 = pnand %p1026_p9, %p1384_p3 }
 0x5a7   : > { %p1032_p8 = por %p1031_p12, %p1030_p5 }
 0x5a8   : > { %p1028_p2 = pneg %p1027_p11 }
 0x5a9   : > { %p1034_p6 = por %p1033_p13, %p1032_p8 }
 0x5ab   : > { %p1035_p4 = pnand %p1034_p6, %p1028_p2 }
 0x5ad   : > { %1038 = shalt.err (!%p1035_p4)
}
 0x5ae   : > { %870 = dma.vmem_to_hbm [thread:$0]  (%p1384_p3), %s1323_s26, 64, %s1321_s28, %s697_s12  }
 0x5af PF: > { %p884_p7 = scmp.ge.s32.totalorder %s1097_s14, 2  ;;  %s723_s21 = sand.u32 1, %s1077_s9  }
 0x5b0   : > { %p1385_p10 = scmp.ne.s32.totalorder %s1377_s24, 0  ;;  %s724_s30 = scalar_lea.sflag [#allocation4], %s723_s21 }
 0x5b2   : > { %p880_p0 = pnand %p884_p7, %p1385_p10 }
 0x5b4   : > { %1072 = dma.done.wait (!%p880_p0), %s724_s30, 64  }
 0x5b5   : > { %1074 = vsyncadd (!%p880_p0), %s724_s30, 4294967232  ;;  %s21_s14 = sadd.s32 1, %s1097_s14   ;;  %s1386_s9 = smov %s1081_s10 }
 0x5b6   : > { %p18_p1 = scmp.ge.s32.totalorder %s21_s14, 6   ;;  %s1387_s10 = smov %s1085_s11 }
 0x5b7   : > { %s1388_s11 = smov %s1181_s23  ;;  %s1389_s12 = smov %s1093_s13 }
 0x5b8   : > { %s1390_s13 = smov %s1392_s17  ;;  %20 = sbr.rel (!%p18_p1) target bundleno = 8 (0x8), region = 86 }
 0x5bf   :  { %729 = vsyncpa [#allocation3], 1 }
 0x5c0   :  { %731 = vsyncpa [#allocation3 + $0x1], 1 }
 0x5c1   :  { %732 = vsyncpa [#allocation6], 1 }
 0x5c2   :  { %734 = vsyncpa [#allocation6 + $0x1], 1 }
 0x5c3   :  { %735 = vsyncpa [#allocation4], 1 }
 0x5c4   :  { %737 = vsyncpa [#allocation4 + $0x1], 1 }

// kernel: model_forward.23
= control target key start
LH: loop header
LB: loop body
LE: loop exit
PB: predicated region body
PF: predicated region fallthrough
CT: control target
= control target key end

     0   :  { %6 = vsyncpa [#allocation3], 0  ;;  %s550_s0 = inlined_call_operand.hbm [shape: bf16[4,8,32], index: 0, kind: input, shape index: {}]   ;;  %s551_s1 = inlined_call_operand.hbm [shape: f32[4,1,32], index: 1, kind: output, shape index: {}]  }
   0x1   :  { %8 = vsyncpa [#allocation3 + $0x1], 0 }
   0x2   :  { %9 = vsyncpa [#allocation4], 0 }
   0x3   :  { %11 = vsyncpa [#allocation4 + $0x1], 0  ;;  %s390_s6 = smov 0   ;;  %s392_s7 = smov 0  }
   0x4   :  { %s394_s8 = smov 0   ;;  %s396_s9 = smov 0  }
   0x5 LB: > { %s411_s10 = sadd.s32 4294967295, %s376_s9   ;;  %s224_s11 = sadd.s32 4294967294, %s376_s9   ;;  %s376_s9 = sphi %s396_s9, %s565_s9   ;;  %s372_s8 = sphi %s394_s8, %s564_s8   ;;  %s368_s7 = sphi %s392_s7, %s563_s7   ;;  %s364_s6 = sphi %s390_s6, %s562_s6  }
   0x6   : > { %s415_s12 = sadd.s32 1, %s376_s9   ;;  %s24_s13 = sadd.s32 1, %s372_s8 }
   0x7   : > { %s21_s14 = ssub.s32 %s376_s9, %s415_s12  ;;  %p31_p0 = scmp.ne.s32.totalorder %s372_s8, %s368_s7 }
   0x8   : > { %p22_p1 = scmp.eq.s32.totalorder %s21_s14, 0  ;;  %p32_p2 = scmp.eq.s32.totalorder %s376_s9, 0 }
   0x9   : > { %p37_p3 = scmp.ne.s32.totalorder %s368_s7, %s364_s6  ;;  %p38_p4 = scmp.eq.s32.totalorder %s411_s10, 0 }
   0xa   : > { %s427_s15 = scalar_select %p22_p1, %s372_s8, %s24_s13  }
   0xb   : > { %p429_p5 = por %p32_p2, %p31_p0  ;;  %p433_p6 = por %p38_p4, %p37_p3 }
   0xc   : > { %p61_p7 = scmp.eq.s32.totalorder %s411_s10, 3  ;;  %p67_p8 = scmp.eq.s32.totalorder %s224_s11, 3 }
   0xd   : > { %p246_p9 = scmp.lt.s32.totalorder %s376_s9, 4  ;;  %s87_s20 = sand.u32 1, %s372_s8  }
   0xe   : > { %p439_p10 = por %p61_p7, %p31_p0  ;;  %p443_p11 = por %p67_p8, %p37_p3 }
   0xf   : > { %s228_s21 = sshll.u32 %s376_s9, 6  ;;  %s227_s22 = sshll.u32 %s87_s20, 2 }
  0x10   : > { %s555_s18 = scalar_select %p439_p10, 1, 0 }
  0x11   : > { %s556_s19 = scalar_select %p443_p11, 1, 0 }
  0x12   : > { %s452_s25 = scalar_lea.hbm %s550_s0, %s228_s21  ;;  %s91_s26 = scalar_lea.vmem [#allocation2], %s227_s22 }
  0x13   : > { %s98_s27 = sshll.u32 %s91_s26, 4  ;;  %p456_p12 = pnand %p246_p9, %p429_p5  ;;  %s460_s27 = int_to_ptr.vmem [resolvable:$true] %s98_s27 }
  0x14   : > { %s88_s29 = scalar_lea.sflag [#allocation3], %s87_s20  ;;  %s280_s30 = scalar_lea.hbm %s452_s25, 64 }
  0x15   : > { %p281_p1 = scmp.ne.s32.totalorder %s452_s25, %s280_s30  ;;  %p282_p2 = pneg %p456_p12 }
  0x16   : > { %s285_s4 = scalar_lea.hbm %s550_s0, 256  ;;  %p286_p5 = scmp.lt.u32.totalorder %s452_s25, %s550_s0 }
  0x17   : > { %p283_p3 = pnand %p282_p2, %p281_p1  ;;  %p287_p7 = scmp.lt.u32.totalorder %s285_s4, %s280_s30 }
  0x18   : > { %p289_p9 = scmp.lt.u32.totalorder %s280_s30, %s452_s25 }
  0x19   : > { %p284_p4 = pneg %p283_p3  ;;  %p288_p8 = por %p287_p7, %p286_p5 }
  0x1b   : > { %p290_p13 = por %p289_p9, %p288_p8 }
  0x1d   : > { %p291_p0 = pnand %p290_p13, %p284_p4 }
  0x1f   : > { %294 = shalt.err (!%p291_p0)
}
  0x20   : > { %s295_s13 = scalar_lea.vmem %s460_s27, 64  ;;  %s378_s14 = smov [#allocation2]  }
  0x21   : > { %p296_p1 = scmp.ne.s32.totalorder %s460_s27, %s295_s13  ;;  %s300_s16 = sshll.u32 %s378_s14, 4  ;;  %s301_s16 = int_to_ptr.vmem [resolvable:$false] %s300_s16 }
  0x22   : > { %s302_s20 = scalar_lea.vmem %s301_s16, 128  ;;  %p303_p10 = scmp.lt.s32.totalorder %s460_s27, %s301_s16 }
  0x23   : > { %p298_p3 = pnand %p296_p1, %p282_p2  ;;  %p304_p5 = scmp.lt.s32.totalorder %s302_s20, %s295_s13 }
  0x25   : > { %p299_p11 = pneg %p298_p3  ;;  %p305_p7 = por %p304_p5, %p303_p10 }
  0x27   : > { %p306_p8 = pnand %p305_p7, %p299_p11 }
  0x29   : > { %309 = shalt.err (!%p306_p8)
}
  0x2a   : > { %241 = dma.hbm_to_vmem [thread:$0]  (!%p456_p12), %s452_s25, 64, %s460_s27, %s88_s29  }
  0x2b   : > { %p558_p13 = scmp.lt.s32.totalorder %s376_s9, 5  ;;  %p559_p0 = scmp.ge.s32.totalorder %s376_s9, 1 }
  0x2d   : > { %p104_p2 = pnand %p559_p0, %p558_p13 }
  0x2e   : > { %s494_s21 = sand.u32 (!%p104_p2), 1, %s368_s7  }
  0x2f   : > { %107 = sbr.rel (%p104_p2) target bundleno = 87 (0x57), region = 24  ;;  %s230_s22 = sshll.u32 (!%p104_p2), %s494_s21, 2 }
  0x30   : > { %s110_s23 = scalar_lea.sflag (!%p104_p2), [#allocation3], %s494_s21  ;;  %s113_s24 = scalar_lea.vmem (!%p104_p2), [#allocation2], %s230_s22 }
  0x36   : > { %355 = dma.done.wait (%p433_p6), %s110_s23, 64  }
  0x37   : > { %357 = vsyncadd (%p433_p6), %s110_s23, 4294967232  ;;  %v131_v0 = vld [vmem:[%s113_s24] sm:$0xf]  ;;  %vm133_vm0 = vcmask 261120   ;;  %s130_s25 = scalar_lea.vmem [#allocation5], %s494_s21  ;;  %s231_s27 = sshll.u32 %s411_s10, 4 }
  0x38   : > { %v132_v1 = vunpack.c.l.bf16 %v131_v0  ;;  %s158_s26 = sshll.u32 %s130_s25, 4  ;;  %vm143_vm1 = vcmask 253952   ;;  %s509_s29 = scalar_lea.hbm %s551_s1, %s231_s27  ;;  %s504_s26 = int_to_ptr.vmem [resolvable:$true] %s158_s26 }
  0x39   : > { %s146_s30 = scalar_lea.sflag [#allocation4], %s494_s21  ;;  %s310_s2 = scalar_lea.vmem %s504_s26, 16 }
  0x3a   : > { %v134_v2 = vsel %vm133_vm0, %v132_v1, 0.0  ;;  %p311_p6 = scmp.ne.s32.totalorder %s504_s26, %s310_s2  ;;  %p560_p10 = scmp.ne.s32.totalorder %s555_s18, 0 }
  0x3b   : > { %v135_v3 = vrot.slane %v134_v2, 4  ;;  %s379_s10 = smov [#allocation5]  }
  0x3c   : > { %p312_p11 = pnand %p311_p6, %p560_p10  ;;  %s314_s3 = sshll.u32 %s379_s10, 4  ;;  %s315_s3 = int_to_ptr.vmem [resolvable:$false] %s314_s3 }
  0x3d   : > { %v136_v4 = vadd.f32 %v135_v3, %v134_v2  ;;  %s316_s4 = scalar_lea.vmem %s315_s3, 32  ;;  %p317_p4 = scmp.lt.s32.totalorder %s504_s26, %s315_s3 }
  0x3e   : > { %p313_p12 = pneg %p312_p11  ;;  %p318_p9 = scmp.lt.s32.totalorder %s316_s4, %s310_s2 }
  0x3f   : > { %v137_v5 = vrot.slane %v136_v4, 2 }
  0x40   : > { %p319_p1 = por %p318_p9, %p317_p4 }
  0x41   : > { %v138_v6 = vadd.f32 %v137_v5, %v136_v4 }
  0x42   : > { %p320_p3 = pnand %p319_p1, %p313_p12 }
  0x43   : > { %v139_v7 = vrot.slane %v138_v6, 1 }
  0x45   : > { %v140_v8 = vadd.f32 %v139_v7, %v138_v6 }
  0x47   : > { %v142_v9 = vmul.f32 0.125, %v140_v8 }
  0x49   : > { %144 = vst.msk [vmem:[%s130_s25] sm:$0x1] %vm143_vm1, %v142_v9 }
  0x4a   : > { %323 = shalt.err (!%p320_p3)
}
  0x4b   : > { %s324_s5 = scalar_lea.hbm %s509_s29, 16  ;;  %s328_s14 = scalar_lea.hbm %s551_s1, 64 }
  0x4c   : > { %p325_p5 = scmp.ne.s32.totalorder %s509_s29, %s324_s5  ;;  %p329_p13 = scmp.lt.u32.totalorder %s509_s29, %s551_s1 }
  0x4d   : > { %p330_p0 = scmp.lt.u32.totalorder %s328_s14, %s324_s5  ;;  %p332_p6 = scmp.lt.u32.totalorder %s324_s5, %s509_s29 }
  0x4e   : > { %p326_p7 = pnand %p325_p5, %p560_p10 }
  0x4f   : > { %p331_p2 = por %p330_p0, %p329_p13 }
  0x50   : > { %p327_p8 = pneg %p326_p7 }
  0x51   : > { %p333_p11 = por %p332_p6, %p331_p2 }
  0x53   : > { %p334_p12 = pnand %p333_p11, %p327_p8 }
  0x55   : > { %337 = shalt.err (!%p334_p12)
}
  0x56   : > { %236 = dma.vmem_to_hbm [thread:$0]  (%p560_p10), %s504_s26, 16, %s509_s29, %s146_s30  }
  0x57 PF: > { %p247_p4 = scmp.ge.s32.totalorder %s376_s9, 2  ;;  %s170_s21 = sand.u32 1, %s364_s6  }
  0x58   : > { %p561_p9 = scmp.ne.s32.totalorder %s556_s19, 0  ;;  %s171_s22 = scalar_lea.sflag [#allocation4], %s170_s21 }
  0x5a   : > { %p243_p1 = pnand %p247_p4, %p561_p9 }
  0x5c   : > { %359 = dma.done.wait (!%p243_p1), %s171_s22, 16  }
  0x5d   : > { %361 = vsyncadd (!%p243_p1), %s171_s22, 4294967280  ;;  %p14_p3 = scmp.ge.s32.totalorder %s415_s12, 6   ;;  %s562_s6 = smov %s368_s7 }
  0x5e   : > { %s563_s7 = smov %s372_s8  ;;  %s564_s8 = smov %s427_s15 }
  0x5f   : > { %s565_s9 = smov %s415_s12  ;;  %16 = sbr.rel (!%p14_p3) target bundleno = 5 (0x5), region = 69 }
  0x66   :  { %175 = vsyncpa [#allocation3], 1 }
  0x67   :  { %177 = vsyncpa [#allocation3 + $0x1], 1 }
  0x68   :  { %178 = vsyncpa [#allocation4], 1 }
  0x69   :  { %180 = vsyncpa [#allocation4 + $0x1], 1 }

// kernel: model_forward.16
= control target key start
LH: loop header
LB: loop body
LE: loop exit
PB: predicated region body
PF: predicated region fallthrough
CT: control target
= control target key end

     0   :  { %8 = vsyncpa [#allocation3], 0  ;;  %s452_s0 = inlined_call_operand.hbm [shape: bf16[32,32], index: 0, kind: input, shape index: {}]   ;;  %s453_s1 = inlined_call_operand.hbm [shape: bf16[32,64], index: 1, kind: input, shape index: {}]   ;;  %s454_s2 = inlined_call_operand.hbm [shape: f32[1,64], index: 2, kind: input, shape index: {}]   ;;  %s455_s3 = inlined_call_operand.hbm [shape: bf16[32,64], index: 3, kind: output, shape index: {}]  }
   0x1   :  { %9 = vsyncpa [#allocation6], 0 }
   0x2   :  { %10 = vsyncpa [#allocation4], 0  ;;  %s362_s12 = smov [#allocation5]   ;;  %s363_s14 = smov [#allocation2]  }
   0x3   :  { %s28_s13 = sshll.u32 %s362_s12, 4  ;;  %s16_s15 = sshll.u32 %s363_s14, 4  ;;  %s29_s13 = int_to_ptr.vmem [resolvable:$true] %s28_s13  ;;  %s388_s15 = int_to_ptr.vmem [resolvable:$true] %s16_s15 }
   0x4   :  { %s268_s18 = scalar_lea.hbm %s453_s1, 256 }
   0x5   :  { %p269_p0 = scmp.ne.s32.totalorder %s453_s1, %s268_s18  ;;  %p272_p1 = scmp.lt.u32.totalorder %s268_s18, %s453_s1 }
   0x7   :  { %p274_p2 = pnand %p272_p1, %p269_p0 }
   0x9   :  { %277 = shalt.err (!%p274_p2)
}
   0xa   :  { %s278_s23 = scalar_lea.vmem %s29_s13, 256  ;;  %p283_p4 = scmp.lt.s32.totalorder %s29_s13, %s29_s13 }
   0xb   :  { %p279_p3 = scmp.ne.s32.totalorder %s29_s13, %s278_s23  ;;  %p284_p5 = scmp.lt.s32.totalorder %s278_s23, %s278_s23 }
   0xd   :  { %p285_p6 = por %p284_p5, %p283_p4 }
   0xf   :  { %p286_p7 = pnand %p285_p6, %p279_p3 }
  0x11   :  { %289 = shalt.err (!%p286_p7)
}
  0x12   :  { %s364_s24 = smov 64   ;;  %s365_s25 = smov 4  }
  0x13   :  { %34 = dma.hbm_to_vmem [thread:$0]  %s453_s1, 256, %s29_s13, [#allocation6], %s364_s24, %s364_s24, %s365_s25  }
  0x14   :  { %s290_s30 = scalar_lea.hbm %s452_s0, 256 }
  0x15   :  { %p291_p8 = scmp.ne.s32.totalorder %s452_s0, %s290_s30  ;;  %p294_p9 = scmp.lt.u32.totalorder %s290_s30, %s452_s0 }
  0x17   :  { %p296_p10 = pnand %p294_p9, %p291_p8 }
  0x19   :  { %299 = shalt.err (!%p296_p10)
}
  0x1a   :  { %s300_s8 = scalar_lea.vmem %s388_s15, 256  ;;  %p305_p12 = scmp.lt.s32.totalorder %s388_s15, %s388_s15 }
  0x1b   :  { %p301_p11 = scmp.ne.s32.totalorder %s388_s15, %s300_s8  ;;  %p306_p13 = scmp.lt.s32.totalorder %s300_s8, %s300_s8 }
  0x1d   :  { %p307_p0 = por %p306_p13, %p305_p12 }
  0x1f   :  { %p308_p1 = pnand %p307_p0, %p301_p11 }
  0x21   :  { %311 = shalt.err (!%p308_p1)
}
  0x22   :  { %22 = dma.hbm_to_vmem [thread:$0]  %s452_s0, 256, %s388_s15, [#allocation3], %s364_s24, %s364_s24, %s365_s25  }
  0x23   :  { %s366_s10 = smov [#allocation7]   ;;  %s312_s14 = scalar_lea.hbm %s454_s2, 16 }
  0x24   :  { %s41_s11 = sshll.u32 %s366_s10, 4  ;;  %p313_p2 = scmp.ne.s32.totalorder %s454_s2, %s312_s14  ;;  %s42_s11 = int_to_ptr.vmem [resolvable:$true] %s41_s11 }
  0x25   :  { %p316_p3 = scmp.lt.u32.totalorder %s312_s14, %s454_s2 }
  0x27   :  { %p318_p4 = pnand %p316_p3, %p313_p2 }
  0x29   :  { %321 = shalt.err (!%p318_p4)
}
  0x2a   :  { %s322_s20 = scalar_lea.vmem %s42_s11, 16  ;;  %s326_s0 = scalar_lea.vmem %s42_s11, 32 }
  0x2b   :  { %p323_p5 = scmp.ne.s32.totalorder %s42_s11, %s322_s20  ;;  %p327_p6 = scmp.lt.s32.totalorder %s42_s11, %s42_s11 }
  0x2c   :  { %p328_p7 = scmp.lt.s32.totalorder %s326_s0, %s322_s20 }
  0x2e   :  { %p329_p8 = por %p328_p7, %p327_p6 }
  0x30   :  { %p330_p9 = pnand %p329_p8, %p323_p5 }
  0x32   :  { %333 = shalt.err (!%p330_p9)
}
  0x33   :  { %44 = dma.hbm_to_vmem [thread:$0]  %s454_s2, 16, %s42_s11, [#allocation6]  }
  0x34   :  { %356 = dma.done.wait [#allocation3], 256  }
  0x35   :  { %357 = vsyncadd [#allocation3], 4294967040 }
  0x36   :  { %358 = dma.done.wait [#allocation6], 272  }
  0x37   :  { %359 = vsyncadd [#allocation6], 4294967024  ;;  %v256_v0 = vld [vmem:[#allocation5] sm:$0xff]   ;;  %v257_v1 = vld [vmem:[#allocation5 + $0x8] sm:$0xff]   ;;  %vm92_vm0 = vcmask 261120   ;;  %vm200_vm1 = vcmask 519168  }
  0x38   :  { %242 = vmatprep.subr.bf16.mxu0 %v256_v0  ;;  %v258_v2 = vld [vmem:[#allocation2] sm:$0xff]   ;;  %v259_v3 = vld [vmem:[#allocation2 + $0x8] sm:$0xff]   ;;  %s367_s2 = smov [#allocation8]  }
  0x39   :  { %243 = vmatpush3.bf16.msra.mxu0 %v256_v0  ;;  %246 = vmatprep.mubr.msk.bf16.mxu0 %vm92_vm0, %v258_v2  ;;  %v223_v4 = vld [vmem:[#allocation7] ss:$0 sm:$0xff]  ;;  %s210_s22 = sshll.u32 %s367_s2, 4  ;;  %s211_s22 = int_to_ptr.vmem [resolvable:$true] %s210_s22 }
  0x3a   :  { %244 = vmatprep.subr.bf16.mxu0 %v257_v1  ;;  %s334_s23 = scalar_lea.vmem %s211_s22, 256  ;;  %p339_p11 = scmp.lt.s32.totalorder %s211_s22, %s211_s22 }
  0x3b   :  { %p335_p10 = scmp.ne.s32.totalorder %s211_s22, %s334_s23  ;;  %p340_p12 = scmp.lt.s32.totalorder %s334_s23, %s334_s23 }
  0x3d   :  { %245 = vmatpush3.bf16.msra.mxu0 %v257_v1  ;;  %p341_p13 = por %p340_p12, %p339_p11 }
  0x3f   :  { %p342_p0 = pnand %p341_p13, %p335_p10 }
  0x40   :  { %247 = vmatmul.mubr.msk.bf16.vlgmr.msra.gmra.mrb[0].mxu0 %vm92_vm0, %v259_v3 }
 0x113   :  { %v248_v5 = vpop.f32.mrb[0].mxu0 }
 0x114   :  { %v142_v6 = vadd.f32 %v248_v5, %v223_v4  ;;  %v133_v7 = vpop.f32.mrb[1].mxu0 }
 0x115   :  { %v134_v8 = vadd.f32 %v223_v4, %v133_v7  ;;  %v249_v9 = vpop.f32.mrb[2].mxu0 }
 0x116   :  { %v154_v10 = vmul.f32 0.044715, %v142_v6  ;;  %v145_v11 = vadd.f32 %v249_v9, %v223_v4  ;;  %v136_v12 = vpop.f32.mrb[3].mxu0  ;;  %v150_v35 = vmul.f32 0.5, %v142_v6 }
 0x117   :  { %v152_v13 = vmul.f32 0.044715, %v134_v8  ;;  %v137_v14 = vadd.f32 %v223_v4, %v136_v12  ;;  %v148_v38 = vmul.f32 0.5, %v134_v8 }
 0x118   :  { %v158_v15 = vmul.f32 %v154_v10, %v142_v6  ;;  %v155_v16 = vmul.f32 0.044715, %v145_v11  ;;  %v151_v41 = vmul.f32 0.5, %v145_v11 }
 0x119   :  { %v156_v17 = vmul.f32 %v152_v13, %v134_v8  ;;  %v153_v18 = vmul.f32 0.044715, %v137_v14  ;;  %v149_v44 = vmul.f32 0.5, %v137_v14 }
 0x11a   :  { %v162_v19 = vmul.f32 %v158_v15, %v142_v6  ;;  %v159_v20 = vmul.f32 %v155_v16, %v145_v11 }
 0x11b   :  { %v160_v21 = vmul.f32 %v156_v17, %v134_v8  ;;  %v157_v22 = vmul.f32 %v153_v18, %v137_v14 }
 0x11c   :  { %v166_v23 = vadd.f32 %v162_v19, %v142_v6  ;;  %v163_v24 = vmul.f32 %v159_v20, %v145_v11 }
 0x11d   :  { %v164_v25 = vadd.f32 %v160_v21, %v134_v8  ;;  %v161_v26 = vmul.f32 %v157_v22, %v137_v14 }
 0x11e   :  { %v170_v27 = vmul.f32 0.7978846, %v166_v23  ;;  %v167_v28 = vadd.f32 %v163_v24, %v145_v11 }
 0x11f   :  { %v168_v29 = vmul.f32 0.7978846, %v164_v25  ;;  %v165_v30 = vadd.f32 %v161_v26, %v137_v14 }
 0x120   :  { %260 = vtanh.f32 %v170_v27  ;;  %v171_v31 = vmul.f32 0.7978846, %v167_v28 }
 0x121   :  { %262 = vtanh.f32 %v168_v29  ;;  %v169_v32 = vmul.f32 0.7978846, %v165_v30 }
 0x122   :  { %264 = vtanh.f32 %v171_v31 }
 0x123   :  { %266 = vtanh.f32 %v169_v32 }
 0x12a   :  { %v261_v33 = vpop.eup %260 }
 0x12b   :  { %v263_v34 = vpop.eup %262  ;;  %v178_v36 = vadd.f32 1.0, %v261_v33 }
 0x12c   :  { %v265_v37 = vpop.eup %264  ;;  %v176_v39 = vadd.f32 1.0, %v263_v34 }
 0x12d   :  { %v267_v40 = vpop.eup %266  ;;  %v179_v42 = vadd.f32 1.0, %v265_v37  ;;  %v182_v43 = vmul.f32 %v178_v36, %v150_v35 }
 0x12e   :  { %v177_v45 = vadd.f32 1.0, %v267_v40  ;;  %v180_v46 = vmul.f32 %v176_v39, %v148_v38 }
 0x12f   :  { %v183_v47 = vmul.f32 %v179_v42, %v151_v41  ;;  %v236_v48 = vpack.c.bf16 %v182_v43, %v182_v43 }
 0x130   :  { %v181_v49 = vmul.f32 %v177_v45, %v149_v44  ;;  %v234_v50 = vpack.c.bf16 %v180_v46, %v180_v46 }
 0x131   :  { %v237_v51 = vpack.c.bf16 %v183_v47, %v183_v47  ;;  %203 = vst.msk [vmem:[#allocation8 + $0x8] sm:$0xf] %vm200_vm1, %v236_v48 }
 0x132   :  { %v235_v52 = vpack.c.bf16 %v181_v49, %v181_v49  ;;  %201 = vst.msk [vmem:[#allocation8] sm:$0xf] %vm200_vm1, %v234_v50 }
 0x133   :  { %204 = vst.msk [vmem:[#allocation8 + $0xc] sm:$0xf] %vm200_vm1, %v237_v51 }
 0x134   :  { %202 = vst.msk [vmem:[#allocation8 + $0x4] sm:$0xf] %vm200_vm1, %v235_v52 }
 0x135   :  { %345 = shalt.err (!%p342_p0)
}
 0x136   :  { %s346_s28 = scalar_lea.hbm %s455_s3, 256 }
 0x137   :  { %p347_p1 = scmp.ne.s32.totalorder %s455_s3, %s346_s28  ;;  %p350_p2 = scmp.lt.u32.totalorder %s346_s28, %s455_s3 }
 0x139   :  { %p352_p3 = pnand %p350_p2, %p347_p1 }
 0x13b   :  { %355 = shalt.err (!%p352_p3)
}
 0x13c   :  { %216 = dma.vmem_to_hbm [thread:$0]  %s211_s22, 256, %s455_s3, [#allocation4], %s364_s24, %s364_s24, %s365_s25  }
 0x13d   :  { %360 = dma.done.wait [#allocation4], 256  }
 0x13e   :  { %361 = vsyncadd [#allocation4], 4294967040 }
 0x13f   :  { %220 = vsyncpa [#allocation3], 1 }
 0x140   :  { %221 = vsyncpa [#allocation6], 1 }
 0x141   :  { %222 = vsyncpa [#allocation4], 1 }

// kernel: model_forward.17
= control target key start
LH: loop header
LB: loop body
LE: loop exit
PB: predicated region body
PF: predicated region fallthrough
CT: control target
= control target key end

     0   :  { %11 = vsyncpa [#allocation3], 0  ;;  %s731_s0 = inlined_call_operand.hbm [shape: bf16[32,64], index: 0, kind: input, shape index: {}]   ;;  %s732_s1 = inlined_call_operand.hbm [shape: bf16[64,32], index: 1, kind: input, shape index: {}]   ;;  %s733_s2 = inlined_call_operand.hbm [shape: f32[1,32], index: 2, kind: input, shape index: {}]   ;;  %s734_s3 = inlined_call_operand.hbm [shape: bf16[32,32], index: 3, kind: input, shape index: {}]   ;;  %s735_s4 = inlined_call_operand.hbm [shape: f32[1,32], index: 4, kind: input, shape index: {}]   ;;  %s736_s5 = inlined_call_operand.hbm [shape: f32[1,32], index: 5, kind: input, shape index: {}]   ;;  %s737_s6 = inlined_call_operand.hbm [shape: bf16[32,32], index: 6, kind: output, shape index: {}]  }
   0x1   :  { %12 = vsyncpa [#allocation6], 0 }
   0x2   :  { %13 = vsyncpa [#allocation9], 0 }
   0x3   :  { %14 = vsyncpa [#allocation12], 0 }
   0x4   :  { %15 = vsyncpa [#allocation4], 0  ;;  %s572_s21 = smov [#allocation5]   ;;  %s573_s23 = smov [#allocation8]  }
   0x5   :  { %s33_s22 = sshll.u32 %s572_s21, 4  ;;  %s55_s24 = sshll.u32 %s573_s23, 4  ;;  %s34_s22 = int_to_ptr.vmem [resolvable:$true] %s33_s22  ;;  %s616_s24 = int_to_ptr.vmem [resolvable:$true] %s55_s24 }
   0x6   :  { %s408_s27 = scalar_lea.hbm %s732_s1, 512 }
   0x7   :  { %p409_p0 = scmp.ne.s32.totalorder %s732_s1, %s408_s27  ;;  %p412_p1 = scmp.lt.u32.totalorder %s408_s27, %s732_s1 }
   0x9   :  { %p414_p2 = pnand %p412_p1, %p409_p0 }
   0xb   :  { %417 = shalt.err (!%p414_p2)
}
   0xc   :  { %s418_s8 = scalar_lea.vmem %s34_s22, 512  ;;  %p423_p4 = scmp.lt.s32.totalorder %s34_s22, %s34_s22 }
   0xd   :  { %p419_p3 = scmp.ne.s32.totalorder %s34_s22, %s418_s8  ;;  %p424_p5 = scmp.lt.s32.totalorder %s418_s8, %s418_s8 }
   0xf   :  { %p425_p6 = por %p424_p5, %p423_p4 }
  0x11   :  { %p426_p7 = pnand %p425_p6, %p419_p3 }
  0x13   :  { %429 = shalt.err (!%p426_p7)
}
  0x14   :  { %s574_s9 = smov 64   ;;  %s575_s10 = smov 4  }
  0x15   :  { %39 = dma.hbm_to_vmem [thread:$0]  %s732_s1, 512, %s34_s22, [#allocation6], %s574_s9, %s574_s9, %s575_s10  }
  0x16   :  { %s430_s15 = scalar_lea.hbm %s734_s3, 256 }
  0x17   :  { %p431_p8 = scmp.ne.s32.totalorder %s734_s3, %s430_s15  ;;  %p434_p9 = scmp.lt.u32.totalorder %s430_s15, %s734_s3 }
  0x19   :  { %p436_p10 = pnand %p434_p9, %p431_p8 }
  0x1b   :  { %439 = shalt.err (!%p436_p10)
}
  0x1c   :  { %s440_s20 = scalar_lea.vmem %s616_s24, 256  ;;  %p445_p12 = scmp.lt.s32.totalorder %s616_s24, %s616_s24 }
  0x1d   :  { %p441_p11 = scmp.ne.s32.totalorder %s616_s24, %s440_s20  ;;  %p446_p13 = scmp.lt.s32.totalorder %s440_s20, %s440_s20 }
  0x1f   :  { %p447_p0 = por %p446_p13, %p445_p12 }
  0x21   :  { %p448_p1 = pnand %p447_p0, %p441_p11 }
  0x23   :  { %451 = shalt.err (!%p448_p1)
}
  0x24   :  { %61 = dma.hbm_to_vmem [thread:$0]  %s734_s3, 256, %s616_s24, [#allocation9], %s574_s9, %s574_s9, %s575_s10  }
  0x25   :  { %s576_s22 = smov [#allocation2]   ;;  %s577_s25 = smov [#allocation7]  }
  0x26   :  { %s21_s23 = sshll.u32 %s576_s22, 4  ;;  %s46_s26 = sshll.u32 %s577_s25, 4  ;;  %s22_s23 = int_to_ptr.vmem [resolvable:$true] %s21_s23  ;;  %s47_s26 = int_to_ptr.vmem [resolvable:$true] %s46_s26 }
  0x27   :  { %s452_s29 = scalar_lea.hbm %s731_s0, 256 }
  0x28   :  { %p453_p2 = scmp.ne.s32.totalorder %s731_s0, %s452_s29  ;;  %p456_p3 = scmp.lt.u32.totalorder %s452_s29, %s731_s0 }
  0x2a   :  { %p458_p4 = pnand %p456_p3, %p453_p2 }
  0x2c   :  { %461 = shalt.err (!%p458_p4)
}
  0x2d   :  { %s462_s3 = scalar_lea.vmem %s22_s23, 256  ;;  %p467_p6 = scmp.lt.s32.totalorder %s22_s23, %s22_s23 }
  0x2e   :  { %p463_p5 = scmp.ne.s32.totalorder %s22_s23, %s462_s3  ;;  %p468_p7 = scmp.lt.s32.totalorder %s462_s3, %s462_s3 }
  0x30   :  { %p469_p8 = por %p468_p7, %p467_p6 }
  0x32   :  { %p470_p9 = pnand %p469_p8, %p463_p5 }
  0x34   :  { %473 = shalt.err (!%p470_p9)
}
  0x35   :  { %27 = dma.hbm_to_vmem [thread:$0]  %s731_s0, 256, %s22_s23, [#allocation3], %s574_s9, %s574_s9, %s575_s10  }
  0x36   :  { %s474_s15 = scalar_lea.hbm %s733_s2, 16 }
  0x37   :  { %p475_p10 = scmp.ne.s32.totalorder %s733_s2, %s474_s15  ;;  %p478_p11 = scmp.lt.u32.totalorder %s474_s15, %s733_s2 }
  0x39   :  { %p480_p12 = pnand %p478_p11, %p475_p10 }
  0x3b   :  { %483 = shalt.err (!%p480_p12)
}
  0x3c   :  { %s484_s20 = scalar_lea.vmem %s47_s26, 16  ;;  %s488_s1 = scalar_lea.vmem %s47_s26, 32 }
  0x3d   :  { %p485_p13 = scmp.ne.s32.totalorder %s47_s26, %s484_s20  ;;  %p489_p0 = scmp.lt.s32.totalorder %s47_s26, %s47_s26 }
  0x3e   :  { %p490_p1 = scmp.lt.s32.totalorder %s488_s1, %s484_s20 }
  0x40   :  { %p491_p2 = por %p490_p1, %p489_p0 }
  0x42   :  { %p492_p3 = pnand %p491_p2, %p485_p13 }
  0x44   :  { %495 = shalt.err (!%p492_p3)
}
  0x45   :  { %49 = dma.hbm_to_vmem [thread:$0]  %s733_s2, 16, %s47_s26, [#allocation6]  }
  0x46   :  { %s578_s22 = smov [#allocation10]   ;;  %s579_s25 = smov [#allocation11]  }
  0x47   :  { %s68_s23 = sshll.u32 %s578_s22, 4  ;;  %s78_s27 = sshll.u32 %s579_s25, 4  ;;  %s69_s23 = int_to_ptr.vmem [resolvable:$true] %s68_s23  ;;  %s79_s27 = int_to_ptr.vmem [resolvable:$true] %s78_s27 }
  0x48   :  { %s496_s30 = scalar_lea.hbm %s735_s4, 16 }
  0x49   :  { %p497_p4 = scmp.ne.s32.totalorder %s735_s4, %s496_s30  ;;  %p500_p5 = scmp.lt.u32.totalorder %s496_s30, %s735_s4 }
  0x4b   :  { %p502_p6 = pnand %p500_p5, %p497_p4 }
  0x4d   :  { %505 = shalt.err (!%p502_p6)
}
  0x4e   :  { %s506_s2 = scalar_lea.vmem %s69_s23, 16  ;;  %s510_s26 = scalar_lea.vmem %s69_s23, 32 }
  0x4f   :  { %p507_p7 = scmp.ne.s32.totalorder %s69_s23, %s506_s2  ;;  %p511_p8 = scmp.lt.s32.totalorder %s69_s23, %s69_s23 }
  0x50   :  { %p512_p9 = scmp.lt.s32.totalorder %s510_s26, %s506_s2 }
  0x52   :  { %p513_p10 = por %p512_p9, %p511_p8 }
  0x54   :  { %p514_p11 = pnand %p513_p10, %p507_p7 }
  0x56   :  { %517 = shalt.err (!%p514_p11)
}
  0x57   :  { %71 = dma.hbm_to_vmem [thread:$0]  %s735_s4, 16, %s69_s23, [#allocation9]  }
  0x58   :  { %s518_s15 = scalar_lea.hbm %s736_s5, 16 }
  0x59   :  { %p519_p12 = scmp.ne.s32.totalorder %s736_s5, %s518_s15  ;;  %p522_p13 = scmp.lt.u32.totalorder %s518_s15, %s736_s5 }
  0x5b   :  { %p524_p0 = pnand %p522_p13, %p519_p12 }
  0x5d   :  { %527 = shalt.err (!%p524_p0)
}
  0x5e   :  { %s528_s20 = scalar_lea.vmem %s79_s27, 16  ;;  %s532_s1 = scalar_lea.vmem %s79_s27, 32 }
  0x5f   :  { %p529_p1 = scmp.ne.s32.totalorder %s79_s27, %s528_s20  ;;  %p533_p2 = scmp.lt.s32.totalorder %s79_s27, %s79_s27 }
  0x60   :  { %p534_p3 = scmp.lt.s32.totalorder %s532_s1, %s528_s20 }
  0x62   :  { %p535_p4 = por %p534_p3, %p533_p2 }
  0x64   :  { %p536_p5 = pnand %p535_p4, %p529_p1 }
  0x66   :  { %539 = shalt.err (!%p536_p5)
}
  0x67   :  { %81 = dma.hbm_to_vmem [thread:$0]  %s736_s5, 16, %s79_s27, [#allocation12]  }
  0x68   :  { %562 = dma.done.wait [#allocation3], 256  }
  0x69   :  { %563 = vsyncadd [#allocation3], 4294967040 }
  0x6a   :  { %564 = dma.done.wait [#allocation6], 528  }
  0x6b   :  { %565 = vsyncadd [#allocation6], 4294966768 }
  0x6c   :  { %566 = dma.done.wait [#allocation9], 272  }
  0x6d   :  { %567 = vsyncadd [#allocation9], 4294967024 }
  0x6e   :  { %568 = dma.done.wait [#allocation12], 16  }
  0x6f   :  { %569 = vsyncadd [#allocation12], 4294967280  ;;  %v394_v0 = vld [vmem:[#allocation5] sm:$0xff]   ;;  %v395_v1 = vld [vmem:[#allocation5 + $0x8] sm:$0xff]   ;;  %vm154_vm0 = vcmask 523264   ;;  %vm222_vm1 = vcmask 261120  }
  0x70   :  { %373 = vmatprep.subr.bf16.mxu0 %v394_v0  ;;  %v396_v2 = vld [vmem:[#allocation5 + $0x10] sm:$0xff]   ;;  %v397_v4 = vld [vmem:[#allocation5 + $0x18] sm:$0xff]   ;;  %v359_v7 = vld [vmem:[#allocation8] sm:$0xff]   ;;  %vm314_vm2 = vcmask 257024   ;;  %s580_s5 = smov [#allocation13]  }
  0x71   :  { %374 = vmatpush3.bf16.msra.mxu0 %v394_v0  ;;  %v398_v3 = vld [vmem:[#allocation2] sm:$0xff]   ;;  %v399_v5 = vld [vmem:[#allocation2 + $0x8] sm:$0xff]   ;;  %v339_v8 = vld [vmem:[#allocation7] ss:$0 sm:$0xff]  ;;  %v360_v11 = vunpack.c.l.bf16 %v359_v7  ;;  %v361_v17 = vunpack.c.h.bf16 %v359_v7  ;;  %s324_s21 = sshll.u32 %s580_s5, 4  ;;  %s325_s21 = int_to_ptr.vmem [resolvable:$true] %s324_s21 }
  0x72   :  { %375 = vmatprep.subr.bf16.mxu0 %v395_v1  ;;  %381 = vmatprep.mubr.msk.bf16.mxu0 %vm154_vm0, %v398_v3  ;;  %v366_v6 = vld [vmem:[#allocation8 + $0x8] sm:$0xff]   ;;  %v348_v62 = vld [vmem:[#allocation10] ss:$0 sm:$0xff]  ;;  %v349_v0 = vld [vmem:[#allocation11] ss:$0 sm:$0xff]  ;;  %s540_s22 = scalar_lea.vmem %s325_s21, 256  ;;  %p545_p7 = scmp.lt.s32.totalorder %s325_s21, %s325_s21 }
  0x73   :  { %v364_v9 = vunpack.c.l.bf16 %v366_v6  ;;  %v365_v14 = vunpack.c.h.bf16 %v366_v6  ;;  %p541_p6 = scmp.ne.s32.totalorder %s325_s21, %s540_s22  ;;  %p546_p8 = scmp.lt.s32.totalorder %s540_s22, %s540_s22 }
  0x75   :  { %376 = vmatpush3.bf16.msra.mxu0 %v395_v1  ;;  %p547_p9 = por %p546_p8, %p545_p7 }
  0x76   :  { %377 = vmatprep.subr.bf16.mxu0 %v396_v2 }
  0x77   :  { %p548_p10 = pnand %p547_p9, %p541_p6 }
  0x79   :  { %378 = vmatpush3.bf16.msra.mxu0 %v396_v2 }
  0x7a   :  { %379 = vmatprep.subr.bf16.mxu0 %v397_v4 }
  0x7d   :  { %380 = vmatpush3.bf16.msra.mxu0 %v397_v4 }
  0x80   :  { %382 = vmatmul.mubr.msk.bf16.vlgmr.msra.gmra.mrb[0].mxu0 %vm154_vm0, %v399_v5 }
 0x153   :  { %v383_v10 = vpop.f32.mrb[0].mxu0 }
 0x154   :  { %v204_v12 = vadd.f32 %v383_v10, %v339_v8  ;;  %v195_v13 = vpop.f32.mrb[1].mxu0 }
 0x155   :  { %v196_v15 = vadd.f32 %v339_v8, %v195_v13  ;;  %v384_v16 = vpop.f32.mrb[2].mxu0 }
 0x156   :  { %v207_v18 = vadd.f32 %v384_v16, %v339_v8  ;;  %v198_v19 = vpop.f32.mrb[3].mxu0  ;;  %v220_v20 = vadd.f32 %v364_v9, %v204_v12 }
 0x157   :  { %v199_v21 = vadd.f32 %v339_v8, %v198_v19  ;;  %v218_v22 = vadd.f32 %v360_v11, %v196_v15 }
 0x158   :  { %v229_v23 = vsel %vm222_vm1, %v220_v20, 0.0  ;;  %v221_v24 = vadd.f32 %v365_v14, %v207_v18 }
 0x159   :  { %230 = vadd.xlane.f32.xlu1 %v229_v23  ;;  %v223_v25 = vsel %vm222_vm1, %v218_v22, 0.0  ;;  %v219_v26 = vadd.f32 %v361_v17, %v199_v21 }
 0x15a   :  { %224 = vadd.xlane.f32.xlu0 %v223_v25  ;;  %v232_v27 = vsel %vm222_vm1, %v221_v24, 0.0 }
 0x15b   :  { %v226_v28 = vsel %vm222_vm1, %v219_v26, 0.0 }
 0x15d   :  { %233 = vadd.xlane.f32.xlu1 %v232_v27 }
 0x15e   :  { %227 = vadd.xlane.f32.xlu0 %v226_v28 }
 0x1e6   :  { %v231_v29 = vpop.xlane.xlu1 %230 }
 0x1e7   :  { %v238_v30 = vmul.f32 0.03125, %v231_v29  ;;  %v225_v31 = vpop.xlane.xlu0 %224 }
 0x1e8   :  { %v236_v32 = vmul.f32 0.03125, %v225_v31 }
 0x1e9   :  { %v242_v33 = vsub.f32 %v220_v20, %v238_v30 }
 0x1ea   :  { %v240_v34 = vsub.f32 %v218_v22, %v236_v32  ;;  %v234_v35 = vpop.xlane.xlu1 %233 }
 0x1eb   :  { %v239_v36 = vmul.f32 0.03125, %v234_v35  ;;  %v228_v37 = vpop.xlane.xlu0 %227  ;;  %v246_v43 = vmul.f32 %v242_v33, %v242_v33 }
 0x1ec   :  { %v237_v38 = vmul.f32 0.03125, %v228_v37  ;;  %v244_v39 = vmul.f32 %v240_v34, %v240_v34 }
 0x1ed   :  { %v243_v40 = vsub.f32 %v221_v24, %v239_v36  ;;  %v254_v45 = vsel %vm222_vm1, %v246_v43, 0.0 }
 0x1ee   :  { %v241_v41 = vsub.f32 %v219_v26, %v237_v38  ;;  %v248_v42 = vsel %vm222_vm1, %v244_v39, 0.0 }
 0x1ef   :  { %249 = vadd.xlane.f32.xlu0 %v248_v42  ;;  %v247_v47 = vmul.f32 %v243_v40, %v243_v40 }
 0x1f0   :  { %v245_v44 = vmul.f32 %v241_v41, %v241_v41 }
 0x1f1   :  { %v257_v48 = vsel %vm222_vm1, %v247_v47, 0.0 }
 0x1f2   :  { %v251_v46 = vsel %vm222_vm1, %v245_v44, 0.0 }
 0x1f3   :  { %255 = vadd.xlane.f32.xlu0 %v254_v45  ;;  %252 = vadd.xlane.f32.xlu1 %v251_v46 }
 0x1f7   :  { %258 = vadd.xlane.f32.xlu1 %v257_v48 }
 0x27c   :  { %v250_v49 = vpop.xlane.xlu0 %249 }
 0x27d   :  { %v260_v50 = vmul.f32 0.03125, %v250_v49 }
 0x27f   :  { %v264_v51 = vadd.f32 1e-12, %v260_v50 }
 0x280   :  { %v253_v52 = vpop.xlane.xlu1 %252  ;;  %v256_v53 = vpop.xlane.xlu0 %255 }
 0x281   :  { %400 = vrsqrt.f32 %v264_v51  ;;  %v261_v54 = vmul.f32 0.03125, %v253_v52  ;;  %v262_v55 = vmul.f32 0.03125, %v256_v53 }
 0x283   :  { %v265_v56 = vadd.f32 1e-12, %v261_v54  ;;  %v266_v57 = vadd.f32 1e-12, %v262_v55 }
 0x284   :  { %v259_v58 = vpop.xlane.xlu1 %258 }
 0x285   :  { %402 = vrsqrt.f32 %v265_v56  ;;  %v263_v59 = vmul.f32 0.03125, %v259_v58 }
 0x286   :  { %404 = vrsqrt.f32 %v266_v57 }
 0x287   :  { %v267_v60 = vadd.f32 1e-12, %v263_v59 }
 0x289   :  { %406 = vrsqrt.f32 %v267_v60 }
 0x28b   :  { %v401_v61 = vpop.eup %400 }
 0x28c   :  { %v272_v63 = vmul.f32 %v401_v61, %v240_v34 }
 0x28e   :  { %v283_v1 = vmul.f32 %v348_v62, %v272_v63 }
 0x28f   :  { %v403_v2 = vpop.eup %402 }
 0x290   :  { %v405_v3 = vpop.eup %404  ;;  %v273_v4 = vmul.f32 %v403_v2, %v241_v41  ;;  %v294_v5 = vadd.f32 %v349_v0, %v283_v1 }
 0x291   :  { %v274_v6 = vmul.f32 %v405_v3, %v242_v33 }
 0x292   :  { %v284_v7 = vmul.f32 %v348_v62, %v273_v4  ;;  %v354_v8 = vpack.c.bf16 %v294_v5, %v294_v5 }
 0x293   :  { %v407_v9 = vpop.eup %406  ;;  %v285_v10 = vmul.f32 %v348_v62, %v274_v6 }
 0x294   :  { %v275_v11 = vmul.f32 %v407_v9, %v243_v40  ;;  %v295_v12 = vadd.f32 %v349_v0, %v284_v7  ;;  %315 = vst.msk [vmem:[#allocation13] sm:$0xf] %vm314_vm2, %v354_v8 }
 0x295   :  { %v296_v13 = vadd.f32 %v349_v0, %v285_v10 }
 0x296   :  { %v286_v14 = vmul.f32 %v348_v62, %v275_v11  ;;  %v355_v15 = vpack.c.bf16 %v295_v12, %v295_v12 }
 0x297   :  { %v356_v16 = vpack.c.bf16 %v296_v13, %v296_v13 }
 0x298   :  { %v297_v17 = vadd.f32 %v349_v0, %v286_v14  ;;  %316 = vst.msk [vmem:[#allocation13 + $0x4] sm:$0xf] %vm314_vm2, %v355_v15 }
 0x299   :  { %317 = vst.msk [vmem:[#allocation13 + $0x8] sm:$0xf] %vm314_vm2, %v356_v16 }
 0x29a   :  { %v357_v18 = vpack.c.bf16 %v297_v17, %v297_v17 }
 0x29c   :  { %318 = vst.msk [vmem:[#allocation13 + $0xc] sm:$0xf] %vm314_vm2, %v357_v18 }
 0x29d   :  { %551 = shalt.err (!%p548_p10)
}
 0x29e   :  { %s552_s27 = scalar_lea.hbm %s737_s6, 256 }
 0x29f   :  { %p553_p11 = scmp.ne.s32.totalorder %s737_s6, %s552_s27  ;;  %p556_p12 = scmp.lt.u32.totalorder %s552_s27, %s737_s6 }
 0x2a1   :  { %p558_p13 = pnand %p556_p12, %p553_p11 }
 0x2a3   :  { %561 = shalt.err (!%p558_p13)
}
 0x2a4   :  { %330 = dma.vmem_to_hbm [thread:$0]  %s325_s21, 256, %s737_s6, [#allocation4], %s574_s9, %s574_s9, %s575_s10  }
 0x2a5   :  { %570 = dma.done.wait [#allocation4], 256  }
 0x2a6   :  { %571 = vsyncadd [#allocation4], 4294967040 }
 0x2a7   :  { %334 = vsyncpa [#allocation3], 1 }
 0x2a8   :  { %335 = vsyncpa [#allocation6], 1 }
 0x2a9   :  { %336 = vsyncpa [#allocation9], 1 }
 0x2aa   :  { %337 = vsyncpa [#allocation12], 1 }
 0x2ab   :  { %338 = vsyncpa [#allocation4], 1 }

</bundles_post_ra>
